<compile_context>
chip_gen: v7x
topology: tpu7x:2x2x1
jax: 0.10.0
libtpu: 0.0.40
codegen_flags: <defaults>
</compile_context>

<pallas_src>
import functools

import jax
import jax.numpy as jnp
from jax.experimental import pallas as pl
from jax.experimental.pallas import tpu as pltpu


def _conv_stats_kernel(main_ref, halo1_ref, halo2_ref, w_ref,
                       conv_ref, stats_ref, *, H, W, Cout, TD):
    """3x3x3 conv for TD output depth planes of one batch element.

    main_ref : (TD, Cin, L)    padded input planes [t*TD, t*TD+TD)
    halo1_ref: (1, Cin, L)     padded input plane   t*TD+TD
    halo2_ref: (1, Cin, L)     padded input plane   t*TD+TD+1
    w_ref    : (Cout, 27*Cin)  weight slab, K ordered (kd, kh, kw, cin)
    conv_ref : (Cout, TD*H*W)  f32 conv output tile (lane-dense, NCDHW-flat)
    stats_ref: (Cout, 2)       per-step BN partials: [:,0]=sum, [:,1]=sumsq
    """
    HW = H * W
    L = main_ref.shape[-1]

    # Padded planes of the current depth window (views / single loads).
    planes = [main_ref[p] for p in range(TD)] + [halo1_ref[0], halo2_ref[0]]

    # Flattened-plane layout: y[j] = P[hp, wp] with j = 1 + hp*W + wp (H padded,
    # W not padded, 1-element guard at each end).  A kw=0 tap never legitimately
    # reads column W-1 of any row and a kw=2 tap never reads column 0, so two
    # pre-masked copies of the window turn every tap into a pure static lane
    # slice (no per-piece selects, as requested by the perf review).
    lane = jax.lax.broadcasted_iota(jnp.int32, (1, L), 1)
    keep_l = (lane % W) != 0      # zero wp == W-1  (wraparound reads of kw=0 taps)
    keep_r = (lane % W) != 1      # zero wp == 0    (wraparound reads of kw=2 taps)
    zeros = jnp.zeros_like(planes[0])
    planes_l = [jnp.where(keep_l, p, zeros) for p in planes]
    planes_r = [jnp.where(keep_r, p, zeros) for p in planes]
    srcs = (planes_l, planes, planes_r)   # indexed by kw

    wmat = w_ref[...]                     # (Cout, 27*Cin), resident across steps

    results = []
    s_tot = jnp.zeros((Cout, 1), jnp.float32)
    q_tot = jnp.zeros((Cout, 1), jnp.float32)
    for td in range(TD):
        pieces = []
        for kd in range(3):
            for kh in range(3):
                for kw in range(3):
                    src = srcs[kw][td + kd]
                    s0 = kh * W + kw
                    pieces.append(src[:, s0:s0 + HW])
        patch = jnp.concatenate(pieces, axis=0)            # (27*Cin, HW)
        acc = jnp.dot(wmat, patch, preferred_element_type=jnp.float32)
        results.append(acc)
        s_tot = s_tot + jnp.sum(acc, axis=1, keepdims=True)
        q_tot = q_tot + jnp.sum(acc * acc, axis=1, keepdims=True)

    conv_ref[...] = results[0] if TD == 1 else jnp.concatenate(results, axis=1)
    stats_ref[...] = jnp.concatenate([s_tot, q_tot], axis=1)


def _bn_relu_kernel(conv_ref, scale_ref, shift_ref, out_ref):
    """Fused BatchNorm (folded per-channel scale/shift) + ReLU, lane-dense tiles."""
    y = conv_ref[...] * scale_ref[...] + shift_ref[...]
    out_ref[...] = jnp.maximum(y, 0.0).astype(out_ref.dtype)


def _vmem_limit_bytes():
    # Generation-aware scoped-VMEM sizing: v5e/v6e have 128 MiB physical VMEM,
    # v7x only 64 MiB.  Use ~half of physical, clamped to [32 MiB, 96 MiB].
    try:
        phys = int(pltpu.get_tpu_info().vmem_capacity_bytes)
    except Exception:
        phys = 64 * 1024 * 1024          # conservative (v7x-sized) fallback
    return max(32 * 1024 * 1024, min(phys // 2, 96 * 1024 * 1024))


def _pick_depth_tile(D, HW, Cin, Cout, L, in_bytes, budget_bytes):
    """Largest TD dividing D whose conv block is lane-dense and fits the budget."""
    def est(td):
        win = (td + 2) * Cin * L
        return int(1.5 * (
            2 * 2 * win * in_bytes            # window (main + halos), double-buffered
            + 2 * win * in_bytes              # the two pre-masked window copies
            + 27 * Cin * HW * in_bytes        # one im2col patch
            + 4 * td * Cout * HW * 4          # f32 plane results + out block (2x buf)
            + 2 * Cout * 27 * Cin * in_bytes))
    cands = [td for td in range(1, D + 1)
             if D % td == 0 and ((td * HW) % 128 == 0 or td == D)]
    fitting = [td for td in cands if est(td) <= budget_bytes]
    return max(fitting) if fitting else min(cands)


def _pick_bn_tile(DHW, cap=8192):
    """Largest multiple-of-128 divisor of DHW (<= cap); fall back to full DHW."""
    best = 0
    t = 128
    while t <= min(DHW, cap):
        if DHW % t == 0:
            best = t
        t += 128
    return best if best else DHW


def conv_bn_relu_3d(x, weight, gamma, beta, eps=1e-5, mxu_dtype=jnp.bfloat16):
    """x: (B, Cin, D, H, W) f32; weight: (Cout, Cin, 3, 3, 3); gamma/beta: (Cout,)."""
    B, Cin, D, H, W = x.shape
    Cout, Cin_w, KD, KH, KW = weight.shape
    assert Cin_w == Cin and (KD, KH, KW) == (3, 3, 3)
    HW = H * W
    DHW = D * HW
    Dp = D + 2
    L = (H + 2) * W + 2

    # Input prep: pad D and H by 1, flatten (H+2, W) with a 1-element guard at
    # each end, cast to the MXU input dtype (halves input HBM traffic for bf16).
    # W is never padded: the W-boundary wrap is handled by the in-kernel
    # pre-masked window copies.
    # TODO(synk): fold this prep pass (and the (TD+2)/TD halo re-fetch) into the
    # kernel with a manual halo DMA from the raw NCDHW input.
    xp = jnp.pad(x, ((0, 0), (0, 0), (1, 1), (1, 1), (0, 0)))      # (B,Cin,Dp,H+2,W)
    y = jnp.transpose(xp, (0, 2, 1, 3, 4)).reshape(B, Dp, Cin, (H + 2) * W)
    y = jnp.pad(y, ((0, 0), (0, 0), (0, 0), (1, 1)))               # (B,Dp,Cin,L)
    y = y.astype(mxu_dtype)

    # Weights: (Cout, Cin, 3,3,3) -> (Cout, 27*Cin), K ordered (kd, kh, kw, cin)
    # to match the patch construction.
    wf = jnp.transpose(weight, (0, 2, 3, 4, 1)).reshape(Cout, 27 * Cin)
    wf = wf.astype(mxu_dtype)

    vmem_limit = _vmem_limit_bytes()
    in_bytes = jnp.dtype(mxu_dtype).itemsize
    TD = _pick_depth_tile(D, HW, Cin, Cout, L, in_bytes, vmem_limit // 2)
    n_dt = D // TD

    kern = functools.partial(_conv_stats_kernel, H=H, W=W, Cout=Cout, TD=TD)
    conv_out, stats = pl.pallas_call(
        kern,
        out_shape=(jax.ShapeDtypeStruct((B, Cout, DHW), jnp.float32),
                   jax.ShapeDtypeStruct((B, n_dt, Cout, 2), jnp.float32)),
        grid_spec=pltpu.PrefetchScalarGridSpec(
            num_scalar_prefetch=0,
            grid=(B, n_dt),
            in_specs=[
                pl.BlockSpec((None, TD, Cin, L), lambda b, t: (b, t, 0, 0)),
                pl.BlockSpec((None, 1, Cin, L),
                             lambda b, t: (b, t * TD + TD, 0, 0)),
                pl.BlockSpec((None, 1, Cin, L),
                             lambda b, t: (b, t * TD + TD + 1, 0, 0)),
                pl.BlockSpec((Cout, 27 * Cin), lambda b, t: (0, 0)),
            ],
            out_specs=(
                pl.BlockSpec((None, Cout, TD * HW), lambda b, t: (b, 0, t)),
                pl.BlockSpec((None, None, Cout, 2), lambda b, t: (b, t, 0, 0)),
            ),
        ),
        compiler_params=pltpu.CompilerParams(
            dimension_semantics=("parallel", "parallel"),
            vmem_limit_bytes=vmem_limit),
    )(y, y, y, wf)

    # Fold training-mode BatchNorm (biased variance, as PyTorch uses for the
    # normalization in the forward) into a per-channel scale/shift.
    n = jnp.float32(B * DHW)
    psum = jnp.sum(stats[..., 0], axis=(0, 1))                      # (Cout,)
    psq = jnp.sum(stats[..., 1], axis=(0, 1))
    mean = psum / n
    # TODO(synk): a Welford-style combine of per-tile (count, mean, M2) partials
    # would be more robust than E[x^2]-E[x]^2 for very large B*D*H*W.
    var = jnp.maximum(psq / n - mean * mean, 0.0)
    scale = gamma.astype(jnp.float32) / jnp.sqrt(var + eps)
    shift = beta.astype(jnp.float32) - mean * scale
    scale2 = scale.reshape(Cout, 1)
    shift2 = shift.reshape(Cout, 1)

    tile = _pick_bn_tile(DHW)
    out_dtype = x.dtype
    # Alias the f32 conv intermediate into the output buffer when dtypes match.
    io_alias = {0: 0} if out_dtype == jnp.float32 else {}
    # TODO(synk): a bf16 conv intermediate would halve this pass's HBM traffic
    # (stats already come from the f32 accumulator) at ~4e-3 relative error.
    out = pl.pallas_call(
        _bn_relu_kernel,
        out_shape=jax.ShapeDtypeStruct((B, Cout, DHW), out_dtype),
        grid_spec=pltpu.PrefetchScalarGridSpec(
            num_scalar_prefetch=0,
            grid=(B, DHW // tile),
            in_specs=[
                pl.BlockSpec((None, Cout, tile), lambda b, s: (b, 0, s)),
                pl.BlockSpec((Cout, 1), lambda b, s: (0, 0)),
                pl.BlockSpec((Cout, 1), lambda b, s: (0, 0)),
            ],
            out_specs=pl.BlockSpec((None, Cout, tile), lambda b, s: (b, 0, s)),
        ),
        input_output_aliases=io_alias,
        compiler_params=pltpu.CompilerParams(
            dimension_semantics=("parallel", "parallel"),
            vmem_limit_bytes=vmem_limit),
    )(conv_out, scale2, shift2)

    # Output is already NCDHW-flattened; this reshape is free (no transpose).
    return out.reshape(B, Cout, D, H, W)


def _reference(x, weight, gamma, beta, eps=1e-5):
    conv = jax.lax.conv_general_dilated(
        x, weight, window_strides=(1, 1, 1),
        padding=((1, 1), (1, 1), (1, 1)),
        dimension_numbers=("NCDHW", "OIDHW", "NCDHW"))
    mean = conv.mean(axis=(0, 2, 3, 4), keepdims=True)
    var = conv.var(axis=(0, 2, 3, 4), keepdims=True)   # biased, like PyTorch BN fwd
    g = gamma.reshape(1, -1, 1, 1, 1)
    b = beta.reshape(1, -1, 1, 1, 1)
    return jnp.maximum(g * (conv - mean) / jnp.sqrt(var + eps) + b, 0.0)


if __name__ == "__main__":
    B, Cin, Cout = 2, 4, 8
    D, H, W = 4, 8, 16            # H*W = 128 -> lane-dense conv output tiles

    key = jax.random.PRNGKey(0)
    kx, kw, kg, kb = jax.random.split(key, 4)
    x = jax.random.normal(kx, (B, Cin, D, H, W), dtype=jnp.float32)
    # Conv3d weight shape per __init__: (out_channels, in_channels, 3, 3, 3), no bias.
    weight = 0.1 * jax.random.normal(kw, (Cout, Cin, 3, 3, 3), dtype=jnp.float32)
    # BatchNorm3d affine params (default init is ones/zeros; use generic values).
    gamma = 1.0 + 0.1 * jax.random.normal(kg, (Cout,), dtype=jnp.float32)
    beta = 0.1 * jax.random.normal(kb, (Cout,), dtype=jnp.float32)

    ref = _reference(x, weight, gamma, beta)

    # f32 MXU path: matches the f32 PyTorch forward tightly.
    fwd_f32 = jax.jit(functools.partial(conv_bn_relu_3d, mxu_dtype=jnp.float32))
    out_f32 = jax.block_until_ready(fwd_f32(x, weight, gamma, beta))
    assert out_f32.shape == (B, Cout, D, H, W)
    err_f32 = float(jnp.abs(out_f32 - ref).max())
    assert jnp.allclose(out_f32, ref, atol=1e-3, rtol=1e-3), err_f32

    # bf16 MXU path (default, per the perf review): bf16 MXU inputs with f32
    # accumulation and f32 BN statistics; slightly looser tolerance reflects
    # the bf16 input rounding only.
    fwd_bf16 = jax.jit(conv_bn_relu_3d)
    out_bf16 = jax.block_until_ready(fwd_bf16(x, weight, gamma, beta))
    assert out_bf16.shape == (B, Cout, D, H, W)
    err_bf16 = float(jnp.abs(out_bf16 - ref).max())
    assert jnp.allclose(out_bf16, ref, atol=2e-2, rtol=2e-2), err_bf16

    print("KERNEL_OK")
</pallas_src>

<mosaic_0001>
module attributes {stable_mosaic.version = 11 : i64} {
  func.func @_conv_stats_kernel(%arg0: i32, %arg1: i32, %arg2: memref<1x4x4x162xf32, #tpu.memory_space<vmem>>, %arg3: memref<1x1x4x162xf32, #tpu.memory_space<vmem>>, %arg4: memref<1x1x4x162xf32, #tpu.memory_space<vmem>>, %arg5: memref<8x108xf32, #tpu.memory_space<vmem>>, %arg6: memref<1x8x512xf32, #tpu.memory_space<vmem>>, %arg7: memref<1x1x8x2xf32, #tpu.memory_space<vmem>>) attributes {dimension_semantics = [#tpu.dimension_semantics<parallel>, #tpu.dimension_semantics<parallel>], iteration_bounds = array<i64: 2, 1>, scalar_prefetch = 0 : i64, scratch_operands = 0 : i64, tpu.core_type = #tpu.core_type<tc>, window_params = [{transform_indices = @transform_0, window_bounds = array<i64: 1, 4, 4, 162>}, {transform_indices = @transform_1, window_bounds = array<i64: 1, 1, 4, 162>}, {transform_indices = @transform_2, window_bounds = array<i64: 1, 1, 4, 162>}, {pipeline_mode = #tpu.pipeline_mode<synchronous>, transform_indices = @transform_3, window_bounds = array<i64: 8, 108>}, {transform_indices = @transform_4, window_bounds = array<i64: 1, 8, 512>}, {transform_indices = @transform_5, window_bounds = array<i64: 1, 1, 8, 2>}]} {
    %c0 = arith.constant 0 : index
    %c0_0 = arith.constant 0 : index
    %c0_1 = arith.constant 0 : index
    %c0_2 = arith.constant 0 : index
    %0 = vector.load %arg2[%c0, %c0_0, %c0_1, %c0_2] : memref<1x4x4x162xf32, #tpu.memory_space<vmem>>, vector<1x1x4x162xf32>
    %1 = vector.shape_cast %0 : vector<1x1x4x162xf32> to vector<4x162xf32>
    %c0_3 = arith.constant 0 : index
    %c1 = arith.constant 1 : index
    %c0_4 = arith.constant 0 : index
    %c0_5 = arith.constant 0 : index
    %2 = vector.load %arg2[%c0_3, %c1, %c0_4, %c0_5] : memref<1x4x4x162xf32, #tpu.memory_space<vmem>>, vector<1x1x4x162xf32>
    %3 = vector.shape_cast %2 : vector<1x1x4x162xf32> to vector<4x162xf32>
    %c0_6 = arith.constant 0 : index
    %c2 = arith.constant 2 : index
    %c0_7 = arith.constant 0 : index
    %c0_8 = arith.constant 0 : index
    %4 = vector.load %arg2[%c0_6, %c2, %c0_7, %c0_8] : memref<1x4x4x162xf32, #tpu.memory_space<vmem>>, vector<1x1x4x162xf32>
    %5 = vector.shape_cast %4 : vector<1x1x4x162xf32> to vector<4x162xf32>
    %c0_9 = arith.constant 0 : index
    %c3 = arith.constant 3 : index
    %c0_10 = arith.constant 0 : index
    %c0_11 = arith.constant 0 : index
    %6 = vector.load %arg2[%c0_9, %c3, %c0_10, %c0_11] : memref<1x4x4x162xf32, #tpu.memory_space<vmem>>, vector<1x1x4x162xf32>
    %7 = vector.shape_cast %6 : vector<1x1x4x162xf32> to vector<4x162xf32>
    %c0_12 = arith.constant 0 : index
    %c0_13 = arith.constant 0 : index
    %c0_14 = arith.constant 0 : index
    %c0_15 = arith.constant 0 : index
    %8 = vector.load %arg3[%c0_12, %c0_13, %c0_14, %c0_15] : memref<1x1x4x162xf32, #tpu.memory_space<vmem>>, vector<1x1x4x162xf32>
    %9 = vector.shape_cast %8 : vector<1x1x4x162xf32> to vector<4x162xf32>
    %c0_16 = arith.constant 0 : index
    %c0_17 = arith.constant 0 : index
    %c0_18 = arith.constant 0 : index
    %c0_19 = arith.constant 0 : index
    %10 = vector.load %arg4[%c0_16, %c0_17, %c0_18, %c0_19] : memref<1x1x4x162xf32, #tpu.memory_space<vmem>>, vector<1x1x4x162xf32>
    %11 = vector.shape_cast %10 : vector<1x1x4x162xf32> to vector<4x162xf32>
    %12 = tpu.iota {dimensions = array<i32: 1>} : vector<1x162xi32>
    %c16_i32 = arith.constant 16 : i32
    %c0_i32 = arith.constant 0 : i32
    %13 = arith.cmpi eq, %c16_i32, %c0_i32 : i32
    %c1_i32 = arith.constant 1 : i32
    %14 = arith.select %13, %c1_i32, %c16_i32 : i32
    %15 = vector.broadcast %14 : i32 to vector<1x162xi32>
    %16 = arith.remsi %12, %15 : vector<1x162xi32>
    %c0_i32_20 = arith.constant 0 : i32
    %17 = vector.broadcast %c0_i32_20 : i32 to vector<1x162xi32>
    %18 = arith.cmpi ne, %16, %17 : vector<1x162xi32>
    %c0_i32_21 = arith.constant 0 : i32
    %19 = vector.broadcast %c0_i32_21 : i32 to vector<1x162xi32>
    %20 = arith.cmpi slt, %16, %19 : vector<1x162xi32>
    %c0_i32_22 = arith.constant 0 : i32
    %21 = arith.cmpi slt, %14, %c0_i32_22 : i32
    %22 = vector.broadcast %21 : i1 to vector<1x162xi1>
    %23 = vector.broadcast %22 : vector<1x162xi1> to vector<1x162xi1>
    %24 = arith.xori %20, %23 : vector<1x162xi1>
    %25 = arith.andi %24, %18 : vector<1x162xi1>
    %26 = vector.broadcast %14 : i32 to vector<1x162xi32>
    %27 = arith.addi %16, %26 : vector<1x162xi32>
    %28 = arith.select %25, %27, %16 : vector<1x162xi1>, vector<1x162xi32>
    %c0_i32_23 = arith.constant 0 : i32
    %29 = vector.broadcast %c0_i32_23 : i32 to vector<1x162xi32>
    %30 = arith.cmpi ne, %28, %29 : vector<1x162xi32>
    %c16_i32_24 = arith.constant 16 : i32
    %c0_i32_25 = arith.constant 0 : i32
    %31 = arith.cmpi eq, %c16_i32_24, %c0_i32_25 : i32
    %c1_i32_26 = arith.constant 1 : i32
    %32 = arith.select %31, %c1_i32_26, %c16_i32_24 : i32
    %33 = vector.broadcast %32 : i32 to vector<1x162xi32>
    %34 = arith.remsi %12, %33 : vector<1x162xi32>
    %c0_i32_27 = arith.constant 0 : i32
    %35 = vector.broadcast %c0_i32_27 : i32 to vector<1x162xi32>
    %36 = arith.cmpi ne, %34, %35 : vector<1x162xi32>
    %c0_i32_28 = arith.constant 0 : i32
    %37 = vector.broadcast %c0_i32_28 : i32 to vector<1x162xi32>
    %38 = arith.cmpi slt, %34, %37 : vector<1x162xi32>
    %c0_i32_29 = arith.constant 0 : i32
    %39 = arith.cmpi slt, %32, %c0_i32_29 : i32
    %40 = vector.broadcast %39 : i1 to vector<1x162xi1>
    %41 = vector.broadcast %40 : vector<1x162xi1> to vector<1x162xi1>
    %42 = arith.xori %38, %41 : vector<1x162xi1>
    %43 = arith.andi %42, %36 : vector<1x162xi1>
    %44 = vector.broadcast %32 : i32 to vector<1x162xi32>
    %45 = arith.addi %34, %44 : vector<1x162xi32>
    %46 = arith.select %43, %45, %34 : vector<1x162xi1>, vector<1x162xi32>
    %c1_i32_30 = arith.constant 1 : i32
    %47 = vector.broadcast %c1_i32_30 : i32 to vector<1x162xi32>
    %48 = arith.cmpi ne, %46, %47 : vector<1x162xi32>
    %cst = arith.constant 0.000000e+00 : f32
    %49 = vector.broadcast %cst : f32 to vector<4x162xf32>
    %50 = vector.shape_cast %30 : vector<1x162xi1> to vector<1x162xi1>
    %51 = vector.broadcast %50 : vector<1x162xi1> to vector<4x162xi1>
    %52 = arith.select %51, %1, %49 : vector<4x162xi1>, vector<4x162xf32>
    %53 = vector.shape_cast %30 : vector<1x162xi1> to vector<1x162xi1>
    %54 = vector.broadcast %53 : vector<1x162xi1> to vector<4x162xi1>
    %55 = arith.select %54, %3, %49 : vector<4x162xi1>, vector<4x162xf32>
    %56 = vector.shape_cast %30 : vector<1x162xi1> to vector<1x162xi1>
    %57 = vector.broadcast %56 : vector<1x162xi1> to vector<4x162xi1>
    %58 = arith.select %57, %5, %49 : vector<4x162xi1>, vector<4x162xf32>
    %59 = vector.shape_cast %30 : vector<1x162xi1> to vector<1x162xi1>
    %60 = vector.broadcast %59 : vector<1x162xi1> to vector<4x162xi1>
    %61 = arith.select %60, %7, %49 : vector<4x162xi1>, vector<4x162xf32>
    %62 = vector.shape_cast %30 : vector<1x162xi1> to vector<1x162xi1>
    %63 = vector.broadcast %62 : vector<1x162xi1> to vector<4x162xi1>
    %64 = arith.select %63, %9, %49 : vector<4x162xi1>, vector<4x162xf32>
    %65 = vector.shape_cast %30 : vector<1x162xi1> to vector<1x162xi1>
    %66 = vector.broadcast %65 : vector<1x162xi1> to vector<4x162xi1>
    %67 = arith.select %66, %11, %49 : vector<4x162xi1>, vector<4x162xf32>
    %68 = vector.shape_cast %48 : vector<1x162xi1> to vector<1x162xi1>
    %69 = vector.broadcast %68 : vector<1x162xi1> to vector<4x162xi1>
    %70 = arith.select %69, %1, %49 : vector<4x162xi1>, vector<4x162xf32>
    %71 = vector.shape_cast %48 : vector<1x162xi1> to vector<1x162xi1>
    %72 = vector.broadcast %71 : vector<1x162xi1> to vector<4x162xi1>
    %73 = arith.select %72, %3, %49 : vector<4x162xi1>, vector<4x162xf32>
    %74 = vector.shape_cast %48 : vector<1x162xi1> to vector<1x162xi1>
    %75 = vector.broadcast %74 : vector<1x162xi1> to vector<4x162xi1>
    %76 = arith.select %75, %5, %49 : vector<4x162xi1>, vector<4x162xf32>
    %77 = vector.shape_cast %48 : vector<1x162xi1> to vector<1x162xi1>
    %78 = vector.broadcast %77 : vector<1x162xi1> to vector<4x162xi1>
    %79 = arith.select %78, %7, %49 : vector<4x162xi1>, vector<4x162xf32>
    %80 = vector.shape_cast %48 : vector<1x162xi1> to vector<1x162xi1>
    %81 = vector.broadcast %80 : vector<1x162xi1> to vector<4x162xi1>
    %82 = arith.select %81, %9, %49 : vector<4x162xi1>, vector<4x162xf32>
    %83 = vector.shape_cast %48 : vector<1x162xi1> to vector<1x162xi1>
    %84 = vector.broadcast %83 : vector<1x162xi1> to vector<4x162xi1>
    %85 = arith.select %84, %11, %49 : vector<4x162xi1>, vector<4x162xf32>
    %c0_31 = arith.constant 0 : index
    %c0_32 = arith.constant 0 : index
    %86 = vector.load %arg5[%c0_31, %c0_32] : memref<8x108xf32, #tpu.memory_space<vmem>>, vector<8x108xf32>
    %cst_33 = arith.constant 0.000000e+00 : f32
    %87 = vector.broadcast %cst_33 : f32 to vector<8x1xf32>
    %cst_34 = arith.constant 0.000000e+00 : f32
    %88 = vector.broadcast %cst_34 : f32 to vector<8x1xf32>
    %89 = vector.extract_strided_slice %52 {offsets = [0, 0], sizes = [4, 128], strides = [1, 1]} : vector<4x162xf32> to vector<4x128xf32>
    %90 = vector.extract_strided_slice %1 {offsets = [0, 1], sizes = [4, 128], strides = [1, 1]} : vector<4x162xf32> to vector<4x128xf32>
    %91 = vector.extract_strided_slice %70 {offsets = [0, 2], sizes = [4, 128], strides = [1, 1]} : vector<4x162xf32> to vector<4x128xf32>
    %92 = vector.extract_strided_slice %52 {offsets = [0, 16], sizes = [4, 128], strides = [1, 1]} : vector<4x162xf32> to vector<4x128xf32>
    %93 = vector.extract_strided_slice %1 {offsets = [0, 17], sizes = [4, 128], strides = [1, 1]} : vector<4x162xf32> to vector<4x128xf32>
    %94 = vector.extract_strided_slice %70 {offsets = [0, 18], sizes = [4, 128], strides = [1, 1]} : vector<4x162xf32> to vector<4x128xf32>
    %95 = vector.extract_strided_slice %52 {offsets = [0, 32], sizes = [4, 128], strides = [1, 1]} : vector<4x162xf32> to vector<4x128xf32>
    %96 = vector.extract_strided_slice %1 {offsets = [0, 33], sizes = [4, 128], strides = [1, 1]} : vector<4x162xf32> to vector<4x128xf32>
    %97 = vector.extract_strided_slice %70 {offsets = [0, 34], sizes = [4, 128], strides = [1, 1]} : vector<4x162xf32> to vector<4x128xf32>
    %98 = vector.extract_strided_slice %55 {offsets = [0, 0], sizes = [4, 128], strides = [1, 1]} : vector<4x162xf32> to vector<4x128xf32>
    %99 = vector.extract_strided_slice %3 {offsets = [0, 1], sizes = [4, 128], strides = [1, 1]} : vector<4x162xf32> to vector<4x128xf32>
    %100 = vector.extract_strided_slice %73 {offsets = [0, 2], sizes = [4, 128], strides = [1, 1]} : vector<4x162xf32> to vector<4x128xf32>
    %101 = vector.extract_strided_slice %55 {offsets = [0, 16], sizes = [4, 128], strides = [1, 1]} : vector<4x162xf32> to vector<4x128xf32>
    %102 = vector.extract_strided_slice %3 {offsets = [0, 17], sizes = [4, 128], strides = [1, 1]} : vector<4x162xf32> to vector<4x128xf32>
    %103 = vector.extract_strided_slice %73 {offsets = [0, 18], sizes = [4, 128], strides = [1, 1]} : vector<4x162xf32> to vector<4x128xf32>
    %104 = vector.extract_strided_slice %55 {offsets = [0, 32], sizes = [4, 128], strides = [1, 1]} : vector<4x162xf32> to vector<4x128xf32>
    %105 = vector.extract_strided_slice %3 {offsets = [0, 33], sizes = [4, 128], strides = [1, 1]} : vector<4x162xf32> to vector<4x128xf32>
    %106 = vector.extract_strided_slice %73 {offsets = [0, 34], sizes = [4, 128], strides = [1, 1]} : vector<4x162xf32> to vector<4x128xf32>
    %107 = vector.extract_strided_slice %58 {offsets = [0, 0], sizes = [4, 128], strides = [1, 1]} : vector<4x162xf32> to vector<4x128xf32>
    %108 = vector.extract_strided_slice %5 {offsets = [0, 1], sizes = [4, 128], strides = [1, 1]} : vector<4x162xf32> to vector<4x128xf32>
    %109 = vector.extract_strided_slice %76 {offsets = [0, 2], sizes = [4, 128], strides = [1, 1]} : vector<4x162xf32> to vector<4x128xf32>
    %110 = vector.extract_strided_slice %58 {offsets = [0, 16], sizes = [4, 128], strides = [1, 1]} : vector<4x162xf32> to vector<4x128xf32>
    %111 = vector.extract_strided_slice %5 {offsets = [0, 17], sizes = [4, 128], strides = [1, 1]} : vector<4x162xf32> to vector<4x128xf32>
    %112 = vector.extract_strided_slice %76 {offsets = [0, 18], sizes = [4, 128], strides = [1, 1]} : vector<4x162xf32> to vector<4x128xf32>
    %113 = vector.extract_strided_slice %58 {offsets = [0, 32], sizes = [4, 128], strides = [1, 1]} : vector<4x162xf32> to vector<4x128xf32>
    %114 = vector.extract_strided_slice %5 {offsets = [0, 33], sizes = [4, 128], strides = [1, 1]} : vector<4x162xf32> to vector<4x128xf32>
    %115 = vector.extract_strided_slice %76 {offsets = [0, 34], sizes = [4, 128], strides = [1, 1]} : vector<4x162xf32> to vector<4x128xf32>
    %116 = tpu.concatenate %89, %90, %91, %92, %93, %94, %95, %96, %97, %98, %99, %100, %101, %102, %103, %104 in 0 : vector<4x128xf32>, vector<4x128xf32>, vector<4x128xf32>, vector<4x128xf32>, vector<4x128xf32>, vector<4x128xf32>, vector<4x128xf32>, vector<4x128xf32>, vector<4x128xf32>, vector<4x128xf32>, vector<4x128xf32>, vector<4x128xf32>, vector<4x128xf32>, vector<4x128xf32>, vector<4x128xf32>, vector<4x128xf32> -> vector<64x128xf32>
    %117 = tpu.concatenate %105, %106, %107, %108, %109, %110, %111, %112, %113, %114, %115 in 0 : vector<4x128xf32>, vector<4x128xf32>, vector<4x128xf32>, vector<4x128xf32>, vector<4x128xf32>, vector<4x128xf32>, vector<4x128xf32>, vector<4x128xf32>, vector<4x128xf32>, vector<4x128xf32>, vector<4x128xf32> -> vector<44x128xf32>
    %118 = tpu.concatenate %116, %117 in 0 : vector<64x128xf32>, vector<44x128xf32> -> vector<108x128xf32>
    %cst_35 = arith.constant dense<0.000000e+00> : vector<8x128xf32>
    %119 = tpu.matmul %86, %118, %cst_35 {dimension_numbers = #tpu.dot_dimension_numbers<[1], [0], [0], [1], [0, 0, 1, 1], [], []>} : vector<8x108xf32>, vector<108x128xf32>, vector<8x128xf32> -> vector<8x128xf32>
    %cst_36 = arith.constant dense<0.000000e+00> : vector<8xf32>
    %120 = vector.multi_reduction <add>, %119, %cst_36 [1] : vector<8x128xf32> to vector<8xf32>
    %121 = vector.shape_cast %120 : vector<8xf32> to vector<8x1xf32>
    %122 = arith.addf %87, %121 : vector<8x1xf32>
    %123 = arith.mulf %119, %119 : vector<8x128xf32>
    %cst_37 = arith.constant dense<0.000000e+00> : vector<8xf32>
    %124 = vector.multi_reduction <add>, %123, %cst_37 [1] : vector<8x128xf32> to vector<8xf32>
    %125 = vector.shape_cast %124 : vector<8xf32> to vector<8x1xf32>
    %126 = arith.addf %88, %125 : vector<8x1xf32>
    %127 = vector.extract_strided_slice %55 {offsets = [0, 0], sizes = [4, 128], strides = [1, 1]} : vector<4x162xf32> to vector<4x128xf32>
    %128 = vector.extract_strided_slice %3 {offsets = [0, 1], sizes = [4, 128], strides = [1, 1]} : vector<4x162xf32> to vector<4x128xf32>
    %129 = vector.extract_strided_slice %73 {offsets = [0, 2], sizes = [4, 128], strides = [1, 1]} : vector<4x162xf32> to vector<4x128xf32>
    %130 = vector.extract_strided_slice %55 {offsets = [0, 16], sizes = [4, 128], strides = [1, 1]} : vector<4x162xf32> to vector<4x128xf32>
    %131 = vector.extract_strided_slice %3 {offsets = [0, 17], sizes = [4, 128], strides = [1, 1]} : vector<4x162xf32> to vector<4x128xf32>
    %132 = vector.extract_strided_slice %73 {offsets = [0, 18], sizes = [4, 128], strides = [1, 1]} : vector<4x162xf32> to vector<4x128xf32>
    %133 = vector.extract_strided_slice %55 {offsets = [0, 32], sizes = [4, 128], strides = [1, 1]} : vector<4x162xf32> to vector<4x128xf32>
    %134 = vector.extract_strided_slice %3 {offsets = [0, 33], sizes = [4, 128], strides = [1, 1]} : vector<4x162xf32> to vector<4x128xf32>
    %135 = vector.extract_strided_slice %73 {offsets = [0, 34], sizes = [4, 128], strides = [1, 1]} : vector<4x162xf32> to vector<4x128xf32>
    %136 = vector.extract_strided_slice %58 {offsets = [0, 0], sizes = [4, 128], strides = [1, 1]} : vector<4x162xf32> to vector<4x128xf32>
    %137 = vector.extract_strided_slice %5 {offsets = [0, 1], sizes = [4, 128], strides = [1, 1]} : vector<4x162xf32> to vector<4x128xf32>
    %138 = vector.extract_strided_slice %76 {offsets = [0, 2], sizes = [4, 128], strides = [1, 1]} : vector<4x162xf32> to vector<4x128xf32>
    %139 = vector.extract_strided_slice %58 {offsets = [0, 16], sizes = [4, 128], strides = [1, 1]} : vector<4x162xf32> to vector<4x128xf32>
    %140 = vector.extract_strided_slice %5 {offsets = [0, 17], sizes = [4, 128], strides = [1, 1]} : vector<4x162xf32> to vector<4x128xf32>
    %141 = vector.extract_strided_slice %76 {offsets = [0, 18], sizes = [4, 128], strides = [1, 1]} : vector<4x162xf32> to vector<4x128xf32>
    %142 = vector.extract_strided_slice %58 {offsets = [0, 32], sizes = [4, 128], strides = [1, 1]} : vector<4x162xf32> to vector<4x128xf32>
    %143 = vector.extract_strided_slice %5 {offsets = [0, 33], sizes = [4, 128], strides = [1, 1]} : vector<4x162xf32> to vector<4x128xf32>
    %144 = vector.extract_strided_slice %76 {offsets = [0, 34], sizes = [4, 128], strides = [1, 1]} : vector<4x162xf32> to vector<4x128xf32>
    %145 = vector.extract_strided_slice %61 {offsets = [0, 0], sizes = [4, 128], strides = [1, 1]} : vector<4x162xf32> to vector<4x128xf32>
    %146 = vector.extract_strided_slice %7 {offsets = [0, 1], sizes = [4, 128], strides = [1, 1]} : vector<4x162xf32> to vector<4x128xf32>
    %147 = vector.extract_strided_slice %79 {offsets = [0, 2], sizes = [4, 128], strides = [1, 1]} : vector<4x162xf32> to vector<4x128xf32>
    %148 = vector.extract_strided_slice %61 {offsets = [0, 16], sizes = [4, 128], strides = [1, 1]} : vector<4x162xf32> to vector<4x128xf32>
    %149 = vector.extract_strided_slice %7 {offsets = [0, 17], sizes = [4, 128], strides = [1, 1]} : vector<4x162xf32> to vector<4x128xf32>
    %150 = vector.extract_strided_slice %79 {offsets = [0, 18], sizes = [4, 128], strides = [1, 1]} : vector<4x162xf32> to vector<4x128xf32>
    %151 = vector.extract_strided_slice %61 {offsets = [0, 32], sizes = [4, 128], strides = [1, 1]} : vector<4x162xf32> to vector<4x128xf32>
    %152 = vector.extract_strided_slice %7 {offsets = [0, 33], sizes = [4, 128], strides = [1, 1]} : vector<4x162xf32> to vector<4x128xf32>
    %153 = vector.extract_strided_slice %79 {offsets = [0, 34], sizes = [4, 128], strides = [1, 1]} : vector<4x162xf32> to vector<4x128xf32>
    %154 = tpu.concatenate %127, %128, %129, %130, %131, %132, %133, %134, %135, %136, %137, %138, %139, %140, %141, %142 in 0 : vector<4x128xf32>, vector<4x128xf32>, vector<4x128xf32>, vector<4x128xf32>, vector<4x128xf32>, vector<4x128xf32>, vector<4x128xf32>, vector<4x128xf32>, vector<4x128xf32>, vector<4x128xf32>, vector<4x128xf32>, vector<4x128xf32>, vector<4x128xf32>, vector<4x128xf32>, vector<4x128xf32>, vector<4x128xf32> -> vector<64x128xf32>
    %155 = tpu.concatenate %143, %144, %145, %146, %147, %148, %149, %150, %151, %152, %153 in 0 : vector<4x128xf32>, vector<4x128xf32>, vector<4x128xf32>, vector<4x128xf32>, vector<4x128xf32>, vector<4x128xf32>, vector<4x128xf32>, vector<4x128xf32>, vector<4x128xf32>, vector<4x128xf32>, vector<4x128xf32> -> vector<44x128xf32>
    %156 = tpu.concatenate %154, %155 in 0 : vector<64x128xf32>, vector<44x128xf32> -> vector<108x128xf32>
    %cst_38 = arith.constant dense<0.000000e+00> : vector<8x128xf32>
    %157 = tpu.matmul %86, %156, %cst_38 {dimension_numbers = #tpu.dot_dimension_numbers<[1], [0], [0], [1], [0, 0, 1, 1], [], []>} : vector<8x108xf32>, vector<108x128xf32>, vector<8x128xf32> -> vector<8x128xf32>
    %cst_39 = arith.constant dense<0.000000e+00> : vector<8xf32>
    %158 = vector.multi_reduction <add>, %157, %cst_39 [1] : vector<8x128xf32> to vector<8xf32>
    %159 = vector.shape_cast %158 : vector<8xf32> to vector<8x1xf32>
    %160 = arith.addf %122, %159 : vector<8x1xf32>
    %161 = arith.mulf %157, %157 : vector<8x128xf32>
    %cst_40 = arith.constant dense<0.000000e+00> : vector<8xf32>
    %162 = vector.multi_reduction <add>, %161, %cst_40 [1] : vector<8x128xf32> to vector<8xf32>
    %163 = vector.shape_cast %162 : vector<8xf32> to vector<8x1xf32>
    %164 = arith.addf %126, %163 : vector<8x1xf32>
    %165 = vector.extract_strided_slice %58 {offsets = [0, 0], sizes = [4, 128], strides = [1, 1]} : vector<4x162xf32> to vector<4x128xf32>
    %166 = vector.extract_strided_slice %5 {offsets = [0, 1], sizes = [4, 128], strides = [1, 1]} : vector<4x162xf32> to vector<4x128xf32>
    %167 = vector.extract_strided_slice %76 {offsets = [0, 2], sizes = [4, 128], strides = [1, 1]} : vector<4x162xf32> to vector<4x128xf32>
    %168 = vector.extract_strided_slice %58 {offsets = [0, 16], sizes = [4, 128], strides = [1, 1]} : vector<4x162xf32> to vector<4x128xf32>
    %169 = vector.extract_strided_slice %5 {offsets = [0, 17], sizes = [4, 128], strides = [1, 1]} : vector<4x162xf32> to vector<4x128xf32>
    %170 = vector.extract_strided_slice %76 {offsets = [0, 18], sizes = [4, 128], strides = [1, 1]} : vector<4x162xf32> to vector<4x128xf32>
    %171 = vector.extract_strided_slice %58 {offsets = [0, 32], sizes = [4, 128], strides = [1, 1]} : vector<4x162xf32> to vector<4x128xf32>
    %172 = vector.extract_strided_slice %5 {offsets = [0, 33], sizes = [4, 128], strides = [1, 1]} : vector<4x162xf32> to vector<4x128xf32>
    %173 = vector.extract_strided_slice %76 {offsets = [0, 34], sizes = [4, 128], strides = [1, 1]} : vector<4x162xf32> to vector<4x128xf32>
    %174 = vector.extract_strided_slice %61 {offsets = [0, 0], sizes = [4, 128], strides = [1, 1]} : vector<4x162xf32> to vector<4x128xf32>
    %175 = vector.extract_strided_slice %7 {offsets = [0, 1], sizes = [4, 128], strides = [1, 1]} : vector<4x162xf32> to vector<4x128xf32>
    %176 = vector.extract_strided_slice %79 {offsets = [0, 2], sizes = [4, 128], strides = [1, 1]} : vector<4x162xf32> to vector<4x128xf32>
    %177 = vector.extract_strided_slice %61 {offsets = [0, 16], sizes = [4, 128], strides = [1, 1]} : vector<4x162xf32> to vector<4x128xf32>
    %178 = vector.extract_strided_slice %7 {offsets = [0, 17], sizes = [4, 128], strides = [1, 1]} : vector<4x162xf32> to vector<4x128xf32>
    %179 = vector.extract_strided_slice %79 {offsets = [0, 18], sizes = [4, 128], strides = [1, 1]} : vector<4x162xf32> to vector<4x128xf32>
    %180 = vector.extract_strided_slice %61 {offsets = [0, 32], sizes = [4, 128], strides = [1, 1]} : vector<4x162xf32> to vector<4x128xf32>
    %181 = vector.extract_strided_slice %7 {offsets = [0, 33], sizes = [4, 128], strides = [1, 1]} : vector<4x162xf32> to vector<4x128xf32>
    %182 = vector.extract_strided_slice %79 {offsets = [0, 34], sizes = [4, 128], strides = [1, 1]} : vector<4x162xf32> to vector<4x128xf32>
    %183 = vector.extract_strided_slice %64 {offsets = [0, 0], sizes = [4, 128], strides = [1, 1]} : vector<4x162xf32> to vector<4x128xf32>
    %184 = vector.extract_strided_slice %9 {offsets = [0, 1], sizes = [4, 128], strides = [1, 1]} : vector<4x162xf32> to vector<4x128xf32>
    %185 = vector.extract_strided_slice %82 {offsets = [0, 2], sizes = [4, 128], strides = [1, 1]} : vector<4x162xf32> to vector<4x128xf32>
    %186 = vector.extract_strided_slice %64 {offsets = [0, 16], sizes = [4, 128], strides = [1, 1]} : vector<4x162xf32> to vector<4x128xf32>
    %187 = vector.extract_strided_slice %9 {offsets = [0, 17], sizes = [4, 128], strides = [1, 1]} : vector<4x162xf32> to vector<4x128xf32>
    %188 = vector.extract_strided_slice %82 {offsets = [0, 18], sizes = [4, 128], strides = [1, 1]} : vector<4x162xf32> to vector<4x128xf32>
    %189 = vector.extract_strided_slice %64 {offsets = [0, 32], sizes = [4, 128], strides = [1, 1]} : vector<4x162xf32> to vector<4x128xf32>
    %190 = vector.extract_strided_slice %9 {offsets = [0, 33], sizes = [4, 128], strides = [1, 1]} : vector<4x162xf32> to vector<4x128xf32>
    %191 = vector.extract_strided_slice %82 {offsets = [0, 34], sizes = [4, 128], strides = [1, 1]} : vector<4x162xf32> to vector<4x128xf32>
    %192 = tpu.concatenate %165, %166, %167, %168, %169, %170, %171, %172, %173, %174, %175, %176, %177, %178, %179, %180 in 0 : vector<4x128xf32>, vector<4x128xf32>, vector<4x128xf32>, vector<4x128xf32>, vector<4x128xf32>, vector<4x128xf32>, vector<4x128xf32>, vector<4x128xf32>, vector<4x128xf32>, vector<4x128xf32>, vector<4x128xf32>, vector<4x128xf32>, vector<4x128xf32>, vector<4x128xf32>, vector<4x128xf32>, vector<4x128xf32> -> vector<64x128xf32>
    %193 = tpu.concatenate %181, %182, %183, %184, %185, %186, %187, %188, %189, %190, %191 in 0 : vector<4x128xf32>, vector<4x128xf32>, vector<4x128xf32>, vector<4x128xf32>, vector<4x128xf32>, vector<4x128xf32>, vector<4x128xf32>, vector<4x128xf32>, vector<4x128xf32>, vector<4x128xf32>, vector<4x128xf32> -> vector<44x128xf32>
    %194 = tpu.concatenate %192, %193 in 0 : vector<64x128xf32>, vector<44x128xf32> -> vector<108x128xf32>
    %cst_41 = arith.constant dense<0.000000e+00> : vector<8x128xf32>
    %195 = tpu.matmul %86, %194, %cst_41 {dimension_numbers = #tpu.dot_dimension_numbers<[1], [0], [0], [1], [0, 0, 1, 1], [], []>} : vector<8x108xf32>, vector<108x128xf32>, vector<8x128xf32> -> vector<8x128xf32>
    %cst_42 = arith.constant dense<0.000000e+00> : vector<8xf32>
    %196 = vector.multi_reduction <add>, %195, %cst_42 [1] : vector<8x128xf32> to vector<8xf32>
    %197 = vector.shape_cast %196 : vector<8xf32> to vector<8x1xf32>
    %198 = arith.addf %160, %197 : vector<8x1xf32>
    %199 = arith.mulf %195, %195 : vector<8x128xf32>
    %cst_43 = arith.constant dense<0.000000e+00> : vector<8xf32>
    %200 = vector.multi_reduction <add>, %199, %cst_43 [1] : vector<8x128xf32> to vector<8xf32>
    %201 = vector.shape_cast %200 : vector<8xf32> to vector<8x1xf32>
    %202 = arith.addf %164, %201 : vector<8x1xf32>
    %203 = vector.extract_strided_slice %61 {offsets = [0, 0], sizes = [4, 128], strides = [1, 1]} : vector<4x162xf32> to vector<4x128xf32>
    %204 = vector.extract_strided_slice %7 {offsets = [0, 1], sizes = [4, 128], strides = [1, 1]} : vector<4x162xf32> to vector<4x128xf32>
    %205 = vector.extract_strided_slice %79 {offsets = [0, 2], sizes = [4, 128], strides = [1, 1]} : vector<4x162xf32> to vector<4x128xf32>
    %206 = vector.extract_strided_slice %61 {offsets = [0, 16], sizes = [4, 128], strides = [1, 1]} : vector<4x162xf32> to vector<4x128xf32>
    %207 = vector.extract_strided_slice %7 {offsets = [0, 17], sizes = [4, 128], strides = [1, 1]} : vector<4x162xf32> to vector<4x128xf32>
    %208 = vector.extract_strided_slice %79 {offsets = [0, 18], sizes = [4, 128], strides = [1, 1]} : vector<4x162xf32> to vector<4x128xf32>
    %209 = vector.extract_strided_slice %61 {offsets = [0, 32], sizes = [4, 128], strides = [1, 1]} : vector<4x162xf32> to vector<4x128xf32>
    %210 = vector.extract_strided_slice %7 {offsets = [0, 33], sizes = [4, 128], strides = [1, 1]} : vector<4x162xf32> to vector<4x128xf32>
    %211 = vector.extract_strided_slice %79 {offsets = [0, 34], sizes = [4, 128], strides = [1, 1]} : vector<4x162xf32> to vector<4x128xf32>
    %212 = vector.extract_strided_slice %64 {offsets = [0, 0], sizes = [4, 128], strides = [1, 1]} : vector<4x162xf32> to vector<4x128xf32>
    %213 = vector.extract_strided_slice %9 {offsets = [0, 1], sizes = [4, 128], strides = [1, 1]} : vector<4x162xf32> to vector<4x128xf32>
    %214 = vector.extract_strided_slice %82 {offsets = [0, 2], sizes = [4, 128], strides = [1, 1]} : vector<4x162xf32> to vector<4x128xf32>
    %215 = vector.extract_strided_slice %64 {offsets = [0, 16], sizes = [4, 128], strides = [1, 1]} : vector<4x162xf32> to vector<4x128xf32>
    %216 = vector.extract_strided_slice %9 {offsets = [0, 17], sizes = [4, 128], strides = [1, 1]} : vector<4x162xf32> to vector<4x128xf32>
    %217 = vector.extract_strided_slice %82 {offsets = [0, 18], sizes = [4, 128], strides = [1, 1]} : vector<4x162xf32> to vector<4x128xf32>
    %218 = vector.extract_strided_slice %64 {offsets = [0, 32], sizes = [4, 128], strides = [1, 1]} : vector<4x162xf32> to vector<4x128xf32>
    %219 = vector.extract_strided_slice %9 {offsets = [0, 33], sizes = [4, 128], strides = [1, 1]} : vector<4x162xf32> to vector<4x128xf32>
    %220 = vector.extract_strided_slice %82 {offsets = [0, 34], sizes = [4, 128], strides = [1, 1]} : vector<4x162xf32> to vector<4x128xf32>
    %221 = vector.extract_strided_slice %67 {offsets = [0, 0], sizes = [4, 128], strides = [1, 1]} : vector<4x162xf32> to vector<4x128xf32>
    %222 = vector.extract_strided_slice %11 {offsets = [0, 1], sizes = [4, 128], strides = [1, 1]} : vector<4x162xf32> to vector<4x128xf32>
    %223 = vector.extract_strided_slice %85 {offsets = [0, 2], sizes = [4, 128], strides = [1, 1]} : vector<4x162xf32> to vector<4x128xf32>
    %224 = vector.extract_strided_slice %67 {offsets = [0, 16], sizes = [4, 128], strides = [1, 1]} : vector<4x162xf32> to vector<4x128xf32>
    %225 = vector.extract_strided_slice %11 {offsets = [0, 17], sizes = [4, 128], strides = [1, 1]} : vector<4x162xf32> to vector<4x128xf32>
    %226 = vector.extract_strided_slice %85 {offsets = [0, 18], sizes = [4, 128], strides = [1, 1]} : vector<4x162xf32> to vector<4x128xf32>
    %227 = vector.extract_strided_slice %67 {offsets = [0, 32], sizes = [4, 128], strides = [1, 1]} : vector<4x162xf32> to vector<4x128xf32>
    %228 = vector.extract_strided_slice %11 {offsets = [0, 33], sizes = [4, 128], strides = [1, 1]} : vector<4x162xf32> to vector<4x128xf32>
    %229 = vector.extract_strided_slice %85 {offsets = [0, 34], sizes = [4, 128], strides = [1, 1]} : vector<4x162xf32> to vector<4x128xf32>
    %230 = tpu.concatenate %203, %204, %205, %206, %207, %208, %209, %210, %211, %212, %213, %214, %215, %216, %217, %218 in 0 : vector<4x128xf32>, vector<4x128xf32>, vector<4x128xf32>, vector<4x128xf32>, vector<4x128xf32>, vector<4x128xf32>, vector<4x128xf32>, vector<4x128xf32>, vector<4x128xf32>, vector<4x128xf32>, vector<4x128xf32>, vector<4x128xf32>, vector<4x128xf32>, vector<4x128xf32>, vector<4x128xf32>, vector<4x128xf32> -> vector<64x128xf32>
    %231 = tpu.concatenate %219, %220, %221, %222, %223, %224, %225, %226, %227, %228, %229 in 0 : vector<4x128xf32>, vector<4x128xf32>, vector<4x128xf32>, vector<4x128xf32>, vector<4x128xf32>, vector<4x128xf32>, vector<4x128xf32>, vector<4x128xf32>, vector<4x128xf32>, vector<4x128xf32>, vector<4x128xf32> -> vector<44x128xf32>
    %232 = tpu.concatenate %230, %231 in 0 : vector<64x128xf32>, vector<44x128xf32> -> vector<108x128xf32>
    %cst_44 = arith.constant dense<0.000000e+00> : vector<8x128xf32>
    %233 = tpu.matmul %86, %232, %cst_44 {dimension_numbers = #tpu.dot_dimension_numbers<[1], [0], [0], [1], [0, 0, 1, 1], [], []>} : vector<8x108xf32>, vector<108x128xf32>, vector<8x128xf32> -> vector<8x128xf32>
    %cst_45 = arith.constant dense<0.000000e+00> : vector<8xf32>
    %234 = vector.multi_reduction <add>, %233, %cst_45 [1] : vector<8x128xf32> to vector<8xf32>
    %235 = vector.shape_cast %234 : vector<8xf32> to vector<8x1xf32>
    %236 = arith.addf %198, %235 : vector<8x1xf32>
    %237 = arith.mulf %233, %233 : vector<8x128xf32>
    %cst_46 = arith.constant dense<0.000000e+00> : vector<8xf32>
    %238 = vector.multi_reduction <add>, %237, %cst_46 [1] : vector<8x128xf32> to vector<8xf32>
    %239 = vector.shape_cast %238 : vector<8xf32> to vector<8x1xf32>
    %240 = arith.addf %202, %239 : vector<8x1xf32>
    %241 = tpu.concatenate %119, %157, %195, %233 in 1 : vector<8x128xf32>, vector<8x128xf32>, vector<8x128xf32>, vector<8x128xf32> -> vector<8x512xf32>
    %c0_47 = arith.constant 0 : index
    %c0_48 = arith.constant 0 : index
    %c0_49 = arith.constant 0 : index
    %242 = vector.load %arg6[%c0_47, %c0_48, %c0_49] : memref<1x8x512xf32, #tpu.memory_space<vmem>>, vector<1x8x512xf32>
    %243 = vector.shape_cast %242 : vector<1x8x512xf32> to vector<8x512xf32>
    %244 = vector.shape_cast %241 : vector<8x512xf32> to vector<1x8x512xf32>
    tpu.vector_store %arg6[%c0_47, %c0_48, %c0_49], %244 {strides = array<i32>} : memref<1x8x512xf32, #tpu.memory_space<vmem>>, vector<1x8x512xf32>,
    %245 = tpu.concatenate %236, %240 in 1 : vector<8x1xf32>, vector<8x1xf32> -> vector<8x2xf32>
    %c0_50 = arith.constant 0 : index
    %c0_51 = arith.constant 0 : index
    %c0_52 = arith.constant 0 : index
    %c0_53 = arith.constant 0 : index
    %246 = vector.load %arg7[%c0_50, %c0_51, %c0_52, %c0_53] : memref<1x1x8x2xf32, #tpu.memory_space<vmem>>, vector<1x1x8x2xf32>
    %247 = vector.shape_cast %246 : vector<1x1x8x2xf32> to vector<8x2xf32>
    %248 = vector.shape_cast %245 : vector<8x2xf32> to vector<1x1x8x2xf32>
    tpu.vector_store %arg7[%c0_50, %c0_51, %c0_52, %c0_53], %248 {strides = array<i32>} : memref<1x1x8x2xf32, #tpu.memory_space<vmem>>, vector<1x1x8x2xf32>,
    return
  }
  func.func @transform_0(%arg0: i32, %arg1: i32) -> (i32, i32, i32, i32) {
    %c0_i32 = arith.constant 0 : i32
    %c0_i32_0 = arith.constant 0 : i32
    %c0_i32_1 = arith.constant 0 : i32
    return %arg0, %arg1, %c0_i32, %c0_i32_0 : i32, i32, i32, i32
  }
  func.func @transform_1(%arg0: i32, %arg1: i32) -> (i32, i32, i32, i32) {
    %c4_i32 = arith.constant 4 : i32
    %0 = arith.muli %arg1, %c4_i32 : i32
    %c4_i32_0 = arith.constant 4 : i32
    %1 = arith.addi %0, %c4_i32_0 : i32
    %c0_i32 = arith.constant 0 : i32
    %c0_i32_1 = arith.constant 0 : i32
    %c0_i32_2 = arith.constant 0 : i32
    return %arg0, %1, %c0_i32, %c0_i32_1 : i32, i32, i32, i32
  }
  func.func @transform_2(%arg0: i32, %arg1: i32) -> (i32, i32, i32, i32) {
    %c4_i32 = arith.constant 4 : i32
    %0 = arith.muli %arg1, %c4_i32 : i32
    %c4_i32_0 = arith.constant 4 : i32
    %1 = arith.addi %0, %c4_i32_0 : i32
    %c1_i32 = arith.constant 1 : i32
    %2 = arith.addi %1, %c1_i32 : i32
    %c0_i32 = arith.constant 0 : i32
    %c0_i32_1 = arith.constant 0 : i32
    %c0_i32_2 = arith.constant 0 : i32
    return %arg0, %2, %c0_i32, %c0_i32_1 : i32, i32, i32, i32
  }
  func.func @transform_3(%arg0: i32, %arg1: i32) -> (i32, i32) {
    %c0_i32 = arith.constant 0 : i32
    %c0_i32_0 = arith.constant 0 : i32
    %c0_i32_1 = arith.constant 0 : i32
    return %c0_i32, %c0_i32_0 : i32, i32
  }
  func.func @transform_4(%arg0: i32, %arg1: i32) -> (i32, i32, i32) {
    %c0_i32 = arith.constant 0 : i32
    %c0_i32_0 = arith.constant 0 : i32
    return %arg0, %c0_i32, %arg1 : i32, i32, i32
  }
  func.func @transform_5(%arg0: i32, %arg1: i32) -> (i32, i32, i32, i32) {
    %c0_i32 = arith.constant 0 : i32
    %c0_i32_0 = arith.constant 0 : i32
    %c0_i32_1 = arith.constant 0 : i32
    return %arg0, %arg1, %c0_i32, %c0_i32_0 : i32, i32, i32, i32
  }
}

module attributes {stable_mosaic.version = 11 : i64} {
  func.func @_bn_relu_kernel(%arg0: i32, %arg1: i32, %arg2: memref<1x8x512xf32, #tpu.memory_space<vmem>>, %arg3: memref<8x1xf32, #tpu.memory_space<vmem>>, %arg4: memref<8x1xf32, #tpu.memory_space<vmem>>, %arg5: memref<1x8x512xf32, #tpu.memory_space<vmem>>) attributes {dimension_semantics = [#tpu.dimension_semantics<parallel>, #tpu.dimension_semantics<parallel>], iteration_bounds = array<i64: 2, 1>, scalar_prefetch = 0 : i64, scratch_operands = 0 : i64, tpu.core_type = #tpu.core_type<tc>, window_params = [{transform_indices = @transform_0, window_bounds = array<i64: 1, 8, 512>}, {pipeline_mode = #tpu.pipeline_mode<synchronous>, transform_indices = @transform_1, window_bounds = array<i64: 8, 1>}, {pipeline_mode = #tpu.pipeline_mode<synchronous>, transform_indices = @transform_2, window_bounds = array<i64: 8, 1>}, {transform_indices = @transform_3, window_bounds = array<i64: 1, 8, 512>}]} {
    %c0 = arith.constant 0 : index
    %c0_0 = arith.constant 0 : index
    %c0_1 = arith.constant 0 : index
    %0 = vector.load %arg2[%c0, %c0_0, %c0_1] : memref<1x8x512xf32, #tpu.memory_space<vmem>>, vector<1x8x512xf32>
    %1 = vector.shape_cast %0 : vector<1x8x512xf32> to vector<8x512xf32>
    %c0_2 = arith.constant 0 : index
    %c0_3 = arith.constant 0 : index
    %2 = vector.load %arg3[%c0_2, %c0_3] : memref<8x1xf32, #tpu.memory_space<vmem>>, vector<8x1xf32>
    %3 = vector.broadcast %2 : vector<8x1xf32> to vector<8x512xf32>
    %4 = arith.mulf %1, %3 : vector<8x512xf32>
    %c0_4 = arith.constant 0 : index
    %c0_5 = arith.constant 0 : index
    %5 = vector.load %arg4[%c0_4, %c0_5] : memref<8x1xf32, #tpu.memory_space<vmem>>, vector<8x1xf32>
    %6 = vector.broadcast %5 : vector<8x1xf32> to vector<8x512xf32>
    %7 = arith.addf %4, %6 : vector<8x512xf32>
    %cst = arith.constant 0.000000e+00 : f32
    %8 = vector.broadcast %cst : f32 to vector<8x512xf32>
    %9 = arith.maximumf %7, %8 : vector<8x512xf32>
    %c0_6 = arith.constant 0 : index
    %c0_7 = arith.constant 0 : index
    %c0_8 = arith.constant 0 : index
    %10 = vector.load %arg5[%c0_6, %c0_7, %c0_8] : memref<1x8x512xf32, #tpu.memory_space<vmem>>, vector<1x8x512xf32>
    %11 = vector.shape_cast %10 : vector<1x8x512xf32> to vector<8x512xf32>
    %12 = vector.shape_cast %9 : vector<8x512xf32> to vector<1x8x512xf32>
    tpu.vector_store %arg5[%c0_6, %c0_7, %c0_8], %12 {strides = array<i32>} : memref<1x8x512xf32, #tpu.memory_space<vmem>>, vector<1x8x512xf32>,
    return
  }
  func.func @transform_0(%arg0: i32, %arg1: i32) -> (i32, i32, i32) {
    %c0_i32 = arith.constant 0 : i32
    %c0_i32_0 = arith.constant 0 : i32
    return %arg0, %c0_i32, %arg1 : i32, i32, i32
  }
  func.func @transform_1(%arg0: i32, %arg1: i32) -> (i32, i32) {
    %c0_i32 = arith.constant 0 : i32
    %c0_i32_0 = arith.constant 0 : i32
    %c0_i32_1 = arith.constant 0 : i32
    return %c0_i32, %c0_i32_0 : i32, i32
  }
  func.func @transform_2(%arg0: i32, %arg1: i32) -> (i32, i32) {
    %c0_i32 = arith.constant 0 : i32
    %c0_i32_0 = arith.constant 0 : i32
    %c0_i32_1 = arith.constant 0 : i32
    return %c0_i32, %c0_i32_0 : i32, i32
  }
  func.func @transform_3(%arg0: i32, %arg1: i32) -> (i32, i32, i32) {
    %c0_i32 = arith.constant 0 : i32
    %c0_i32_0 = arith.constant 0 : i32
    return %arg0, %c0_i32, %arg1 : i32, i32, i32
  }
}

</mosaic_0001>

<bundles_post_ra>
// kernel: conv_bn_relu_3d.3
= control target key start
LH: loop header
LB: loop body
LE: loop exit
PB: predicated region body
PF: predicated region fallthrough
CT: control target
= control target key end

     0   :  { %s413_s12 = smov 0   ;;  %s415_s13 = smov 0   ;;  %s452_s0 = inlined_call_operand.vmem [shape: f32[2,8,512], index: 0, kind: input, shape index: {}, may-alias: {0,3}]   ;;  %s453_s1 = inlined_call_operand.vmem [shape: f32[8,1], index: 1, kind: input, shape index: {}]   ;;  %s454_s2 = inlined_call_operand.vmem [shape: f32[8,1], index: 2, kind: input, shape index: {}]   ;;  %s455_s3 = inlined_call_operand.vmem [shape: f32[2,8,512], index: 3, kind: output, shape index: {}, may-alias: {0,3}]  }
   0x1   :  { %s417_s14 = smov 0  }
   0x2 LB: > { %s25_s15 = sadd.s32 1, %s386_s13  ;;  %p333_p0 = scmp.ge.s32.totalorder %s390_s14, 1  ;;  %s390_s14 = sphi %s417_s14, %s13_s14   ;;  %s386_s13 = sphi %s415_s13, %s457_s13   ;;  %s382_s12 = sphi %s413_s12, %s456_s12  }
   0x3   : > { %p27_p1 = scmp.ge.s32.totalorder %s25_s15, 2  ;;  %p158_p2 = scmp.lt.s32.totalorder %s390_s14, 3 }
   0x5   : > { %s459_s15 = smov (%p27_p1, %s25_s15), 0  ;;  %p159_p3 = pnand %p333_p0, %p158_p2 }
   0x6   : > { %v214_v0 = vld [vmem:[%s453_s1] sm:$0xff] (!%p159_p3)  ;;  %v392_v1 = vmov (!%p159_p3), 0   ;;  %p191_p4 = scmp.lt.s32.totalorder (!%p159_p3), %s382_s12, 1 }
   0x7   : > { %162 = sbr.rel (%p159_p3) target bundleno = 146 (0x92), region = 32  ;;  %367 = vset.pattern.permute.xlu0 (!%p159_p3), %v392_v1  ;;  %v224_v2 = vld [vmem:[%s454_s2] sm:$0xff] (!%p159_p3) }
   0x8   : > { %217 = vperm.xlu0 (!%p159_p3), %367, %v214_v0  }
   0xc   : > { %227 = vperm.xlu0 (!%p159_p3), %367, %v224_v2  }
   0xe   : > { %s461_s12 = smov (!%p191_p4, %s382_s12), 1 }
   0xf   : > { %s340_s20 = sshll.u32 %s461_s12, 5 }
  0x10   : > { %s198_s23 = scalar_lea.vmem %s452_s0, %s340_s20  ;;  %s208_s26 = scalar_lea.vmem %s455_s3, %s340_s20 }
  0x11   : > { %v210_v3 = vld [vmem:[%s198_s23] sm:$0xff]  ;;  %v211_v5 = vld [vmem:[%s198_s23 + $0x8] sm:$0xff]  ;;  %v212_v6 = vld [vmem:[%s198_s23 + $0x10] sm:$0xff] }
  0x12   : > { %v213_v7 = vld [vmem:[%s198_s23 + $0x18] sm:$0xff] }
  0x87   : > { %v218_v4 = vpop.permute.xlu0 %217 }
  0x88   : > { %v220_v8 = vmul.f32 %v218_v4, %v210_v3  ;;  %v221_v9 = vmul.f32 %v218_v4, %v211_v5  ;;  %v222_v10 = vmul.f32 %v218_v4, %v212_v6  ;;  %v223_v11 = vmul.f32 %v218_v4, %v213_v7 }
  0x8b   : > { %v228_v12 = vpop.permute.xlu0 %227 }
  0x8c   : > { %v230_v13 = vadd.f32 %v228_v12, %v220_v8  ;;  %v231_v14 = vadd.f32 %v228_v12, %v221_v9  ;;  %v232_v15 = vadd.f32 %v228_v12, %v222_v10  ;;  %v233_v16 = vadd.f32 %v228_v12, %v223_v11 }
  0x8e   : > { %v234_v17 = vmax.f32 %v230_v13, 0.0  ;;  %v235_v18 = vmax.f32 %v231_v14, 0.0  ;;  %v236_v19 = vmax.f32 %v232_v15, 0.0  ;;  %v237_v20 = vmax.f32 %v233_v16, 0.0 }
  0x90   : > { %238 = vst [vmem:[%s208_s26] sm:$0xff] %v234_v17  ;;  %239 = vst [vmem:[%s208_s26 + $0x8] sm:$0xff] %v235_v18 }
  0x91   : > { %240 = vst [vmem:[%s208_s26 + $0x10] sm:$0xff] %v236_v19  ;;  %241 = vst [vmem:[%s208_s26 + $0x18] sm:$0xff] %v237_v20 }
  0x92 PF: > { %s13_s14 = sadd.s32 1, %s390_s14   ;;  %s456_s12 = smov %s386_s13 }
  0x93   : > { %p10_p5 = scmp.ge.s32.totalorder %s13_s14, 4   ;;  %s457_s13 = smov %s459_s15 }
  0x95   :  { %12 = sbr.rel (!%p10_p5) target bundleno = 2 (0x2), region = 62 }

// kernel: conv_bn_relu_3d.2
= control target key start
LH: loop header
LB: loop body
LE: loop exit
PB: predicated region body
PF: predicated region fallthrough
CT: control target
= control target key end

     0   :  { %s2863_s18 = smov 0   ;;  %s2865_s19 = smov 0   ;;  %s3800_s0 = inlined_call_operand.vmem [shape: f32[2,6,4,162], index: 0, kind: input, shape index: {}, may-alias: {0,1,2}]   ;;  %s3801_s1 = inlined_call_operand.vmem [shape: f32[2,6,4,162], index: 1, kind: input, shape index: {}, may-alias: {0,1,2}]   ;;  %s3802_s2 = inlined_call_operand.vmem [shape: f32[2,6,4,162], index: 2, kind: input, shape index: {}, may-alias: {0,1,2}]   ;;  %s3803_s3 = inlined_call_operand.vmem [shape: f32[8,108], index: 3, kind: input, shape index: {}]   ;;  %s3804_s4 = inlined_call_operand.vmem [shape: f32[2,8,512], index: 4, kind: output, shape index: {0}]   ;;  %s3805_s5 = inlined_call_operand.vmem [shape: f32[2,1,8,2], index: 5, kind: output, shape index: {1}]  }
   0x1   :  { %s2867_s20 = smov 0  }
   0x2 LB: > { %s28_s21 = sadd.s32 1, %s2808_s19  ;;  %p1883_p0 = scmp.ge.s32.totalorder %s2812_s20, 1  ;;  %s2812_s20 = sphi %s2867_s20, %s16_s20   ;;  %s2808_s19 = sphi %s2865_s19, %s3830_s19   ;;  %s2804_s18 = sphi %s2863_s18, %s3829_s18  }
   0x3   : > { %p30_p1 = scmp.ge.s32.totalorder %s28_s21, 2  ;;  %p272_p2 = scmp.lt.s32.totalorder %s2812_s20, 3 }
   0x5   : > { %s3832_s21 = smov (%p30_p1, %s28_s21), 0  ;;  %p273_p3 = pnand %p1883_p0, %p272_p2 }
   0x6   : > { %p349_p4 = scmp.lt.s32.totalorder (!%p273_p3), %s2804_s18, 1  ;;  %v416_v0 = vlaneseq (!%p273_p3)  ;;  %s2814_s26 = smov (!%p273_p3), 127   ;;  %vm503_vm4 = vcmask (!%p273_p3), 1039360   ;;  %vm609_vm5 = vcmask (!%p273_p3), 1043456   ;;  %vm530_vm6 = vcmask (!%p273_p3), 908288  }
   0x7   : > { %276 = sbr.rel (%p273_p3) target bundleno = 768 (0x300), region = 36  ;;  %s2815_s27 = smov (!%p273_p3), 111   ;;  %vm546_vm7 = vcmask (!%p273_p3), 785408   ;;  %vm553_vm8 = vcmask (!%p273_p3), 777216   ;;  %vm512_vm9 = vcmask (!%p273_p3), 1031168   ;;  %vm523_vm10 = vcmask (!%p273_p3), 916480  }
   0x8   : > { %v417_v1 = vand.u32 (!%p273_p3), 127, %v416_v0  ;;  %s2816_s28 = smov (!%p273_p3), 95   ;;  %s2817_s29 = smov (!%p273_p3), 96   ;;  %vm539_vm11 = vcmask (!%p273_p3), 900096   ;;  %vm560_vm12 = vcmask (!%p273_p3), 769024   ;;  %vm634_vm13 = vcmask (!%p273_p3), 261120  }
   0x9   : > { %s2818_s30 = smov (!%p273_p3), 126   ;;  %s2819_s6 = smov (!%p273_p3), 94   ;;  %vm655_vm14 = vcmask (!%p273_p3), 138240   ;;  %vm644_vm15 = vcmask (!%p273_p3), 252928  }
   0xa   : > { %v418_v2 = vadd.s32 (!%p273_p3), 128, %v417_v1  ;;  %v423_v3 = vand.u32 (!%p273_p3), 15, %v417_v1  ;;  %s2820_s8 = smov (!%p273_p3), 110   ;;  %s2821_s9 = smov (!%p273_p3), 112  }
   0xb   : > { %s2823_s13 = smov (!%p273_p3), 33   ;;  %s2824_s14 = smov (!%p273_p3), 32  }
   0xc   : > { %v430_v4 = vand.u32 (!%p273_p3), 15, %v418_v2  ;;  %vm2892_vm0 = vcmp.ne.s32.totalorder (!%p273_p3), %v423_v3, 0  ;;  %vm2905_vm2 = vcmp.ne.s32.totalorder (!%p273_p3), %v423_v3, 1  ;;  %s2825_s15 = smov (!%p273_p3), 31   ;;  %s2826_s16 = smov (!%p273_p3), 17  }
   0xd   : > { %s2827_s17 = smov (!%p273_p3), 16   ;;  %s2828_s24 = smov (!%p273_p3), 15  }
   0xe   : > { %s3834_s18 = smov (!%p349_p4, %s2804_s18), 1  ;;  %vm2897_vm1 = vcmp.ne.s32.totalorder %v430_v4, 0  ;;  %vm2911_vm3 = vcmp.ne.s32.totalorder %v430_v4, 1 }
   0xf   : > { %s2884_s22 = smul.u32 48, %s3834_s18 }
  0x11   : > { %s2890_s25 = scalar_lea.vmem %s3800_s0, %s2884_s22  ;;  %s1906_s7 = sadd.s32 40, %s2884_s22 }
  0x12   : > { %v407_v6 = vld [vmem:[%s2890_s25] sm:$0xff]  ;;  %v2916_v16 = vld [vmem:[%s2890_s25 + $0x8] sm:$0xff]  ;;  %s2954_s12 = scalar_lea.vmem %s3802_s2, %s1906_s7  ;;  %v2968_v38 = vld [vmem:[%s2890_s25 + $0x10] sm:$0xff]  ;;  %s1904_s23 = sadd.s32 32, %s2884_s22 }
  0x13   : > { %v498_v7 = vcombine.low %v407_v6, %v407_v6  ;;  %v452_v8 = vcombine.high %v407_v6, %v407_v6  ;;  %v2903_v10 = vsel %vm2892_vm0, %v407_v6, 0.0  ;;  %v485_v18 = vsel %vm2905_vm2, %v407_v6, 0.0  ;;  %v2965_v37 = vld [vmem:[%s2954_s12] sm:$0xff]  ;;  %v2971_v39 = vld [vmem:[%s2890_s25 + $0x18] sm:$0xff]  ;;  %s2829_s7 = smov 1   ;;  %s374_s11 = scalar_lea.vmem %s3801_s1, %s1904_s23 }
  0x14   : > { %v2927_v20 = vcombine.high %v2916_v16, %v2916_v16  ;;  %v533_v21 = vrot.slane %v485_v18, 4  ;;  %v517_v22 = vrot.slane %v2903_v10, 4  ;;  %v487_v26 = vsel %vm2905_vm2, %v2916_v16, 0.0 }
  0x15   : > { %v2226_v12 = vpack.i.bf16 %v407_v6, %v498_v7  ;;  %v2231_v13 = vpack.i.bf16 %v452_v8, %v407_v6  ;;  %v455_v14 = vsel %vm2897_vm1, %v452_v8, 0.0  ;;  %v486_v19 = vsel %vm2911_vm3, %v452_v8, 0.0 }
  0x16   : > { %v2246_v17 = vpack.i.bf16 %v455_v14, %v2903_v10  ;;  %v2241_v23 = vpack.i.bf16 %v486_v19, %v485_v18  ;;  %v534_v24 = vrot.slane %v486_v19, 4  ;;  %v518_v25 = vrot.slane %v455_v14, 4 }
  0x17   : > { %2227 = vrot.lane.b32.xlu0 %v2226_v12, %s2814_s26  ;;  %2232 = vrot.lane.b32.xlu1 %v2231_v13, %s2815_s27  ;;  %v488_v27 = vsel %vm2911_vm3, %v2927_v20, 0.0  ;;  %v574_v30 = vrot.slane %v487_v26, 4  ;;  %v2266_v32 = vpack.i.bf16 %v2927_v20, %v2916_v16  ;;  %v2949_v34 = vcombine.low %v2916_v16, %v2916_v16 }
  0x18   : > { %v2261_v28 = vpack.i.bf16 %v534_v24, %v533_v21  ;;  %v2256_v29 = vpack.i.bf16 %v518_v25, %v517_v22  ;;  %v575_v31 = vrot.slane %v488_v27, 4  ;;  %v2959_v35 = vsel %vm2892_vm0, %v2916_v16, 0.0 }
  0x19   : > { %v460_v36 = vsel %vm2897_vm1, %v2927_v20, 0.0  ;;  %v2981_v41 = vpack.i.bf16 %v2916_v16, %v2949_v34  ;;  %v564_v42 = vrot.slane %v2959_v35, 4  ;;  %v2984_v44 = vpack.i.bf16 %v488_v27, %v487_v26 }
  0x1a   : > { %v2945_v33 = vpack.i.bf16 %v575_v31, %v574_v30  ;;  %v2977_v40 = vpack.i.bf16 %v460_v36, %v2959_v35  ;;  %v602_v43 = vrot.slane %v460_v36, 4  ;;  %v2988_v45 = vcombine.high %v2968_v38, %v2968_v38 }
  0x1b   : > { %2237 = vrot.lane.b32.xlu0 %v2226_v12, %s2816_s28  ;;  %2247 = vrot.lane.b32.xlu1 %v2246_v17, %s2817_s29  ;;  %v2993_v46 = vsel %vm2892_vm0, %v2965_v37, 0.0  ;;  %v2997_v47 = vcombine.high %v2965_v37, %v2965_v37  ;;  %v3002_v48 = vsel %vm2892_vm0, %v2968_v38, 0.0  ;;  %v3007_v49 = vsel %vm2892_vm0, %v2971_v39, 0.0 }
  0x1c   : > { %v495_v50 = vsel %vm2905_vm2, %v2965_v37, 0.0  ;;  %v1527_v51 = vrot.slane %v2993_v46, 4  ;;  %v3019_v52 = vpack.i.bf16 %v602_v43, %v564_v42  ;;  %v3023_v53 = vcombine.low %v2968_v38, %v2968_v38 }
  0x1d   : > { %v496_v54 = vsel %vm2911_vm3, %v2997_v47, 0.0  ;;  %v3031_v55 = vsel %vm2897_vm1, %v2997_v47, 0.0  ;;  %v489_v56 = vsel %vm2905_vm2, %v2968_v38, 0.0  ;;  %v1543_v59 = vrot.slane %v495_v50, 4 }
  0x1e   : > { %v3036_v57 = vpack.i.bf16 %v496_v54, %v495_v50  ;;  %v1528_v58 = vrot.slane %v3031_v55, 4  ;;  %v490_v60 = vsel %vm2911_vm3, %v2988_v45, 0.0  ;;  %v667_v61 = vrot.slane %v489_v56, 4 }
  0x1f   : > { %2242 = vrot.lane.b32.xlu0 %v2241_v23, %s2818_s30  ;;  %2252 = vrot.lane.b32.xlu1 %v2241_v23, %s2819_s6  ;;  %v1544_v62 = vrot.slane %v496_v54, 4  ;;  %v2456_v63 = vpack.i.bf16 %v3031_v55, %v2993_v46  ;;  %v668_v0 = vrot.slane %v490_v60, 4  ;;  %v2301_v2 = vpack.i.bf16 %v3007_v49, %v3002_v48 }
  0x20   : > { %v3044_v1 = vpack.i.bf16 %v1528_v58, %v1527_v51  ;;  %v465_v4 = vsel %vm2897_vm1, %v2988_v45, 0.0  ;;  %v2822_v6 = vmov 0.0|0.0   ;;  %v3066_v8 = vpack.i.bf16 %v2968_v38, %v3023_v53 }
  0x21   : > { %v3052_v3 = vpack.i.bf16 %v1544_v62, %v1543_v59  ;;  %2092 = vmatprep.subr.bf16.mxu0 %v2822_v6  ;;  %v3058_v7 = vpack.i.bf16 %v668_v0, %v667_v61  ;;  %2114 = vmatprep.subr.bf16.mxu1 %v2822_v6  ;;  %v3068_v12 = vpack.i.bf16 %v490_v60, %v489_v56  ;;  %v3808_v13 = vrot.slane %v3002_v48, 4 }
  0x22   : > { %v650_v14 = vrot.slane %v465_v4, 4  ;;  %v3081_v18 = vpack.i.bf16 %v2988_v45, %v2968_v38  ;;  %v3085_v19 = vcombine.high %v2971_v39, %v2971_v39  ;;  %v3092_v21 = vpack.i.bf16 %v465_v4, %v3002_v48 }
  0x23   : > { %2262 = vrot.lane.b32.xlu0 %v2261_v28, %s2820_s8  ;;  %2257 = vrot.lane.b32.xlu1 %v2256_v29, %s2821_s9  ;;  %v3096_v22 = vcombine.low %v2971_v39, %v2971_v39  ;;  %v3807_v25 = vrot.slane %v3007_v49, 4  ;;  %v491_v27 = vsel %vm2905_vm2, %v2971_v39, 0.0  ;;  %v3189_v4 = vcombine.low %v2965_v37, %v2965_v37 }
  0x24   : > { %v3077_v17 = vpack.i.bf16 %v650_v14, %v3808_v13  ;;  %v470_v23 = vsel %vm2897_vm1, %v3085_v19, 0.0  ;;  %v492_v28 = vsel %vm2911_vm3, %v3085_v19, 0.0  ;;  %v963_v30 = vrot.slane %v491_v27, 4 }
  0x25   : > { %v3108_v24 = vpack.i.bf16 %v2971_v39, %v3096_v22  ;;  %v948_v26 = vrot.slane %v470_v23, 4  ;;  %v964_v31 = vrot.slane %v492_v28, 4  ;;  %v3134_v36 = vpack.i.bf16 %v492_v28, %v491_v27 }
  0x26   : > { %v3148_v51 = vpack.i.bf16 %v3085_v19, %v2971_v39  ;;  %v3165_v59 = vpack.i.bf16 %v470_v23, %v3007_v49  ;;  %v2401_v23 = vpack.i.bf16 %v2965_v37, %v3189_v4  ;;  %v2436_v28 = vpack.i.bf16 %v2997_v47, %v2965_v37 }
  0x27   : > { %2267 = vrot.lane.b32.xlu0 %v2266_v32, %s2814_s26  ;;  %2272 = vrot.lane.b32.xlu1 %v2945_v33, %s2818_s30  ;;  %v3126_v29 = vpack.i.bf16 %v948_v26, %v3807_v25  ;;  %v3128_v32 = vld [vmem:[%s374_s11] sm:$0xff]  ;;  %v3136_v43 = vpack.i.bf16 %v964_v31, %v963_v30  ;;  %v2466_v37 = vpack.i.bf16 %v2968_v38, %v2949_v34 }
  0x28   : > { %v3140_v50 = vcombine.high %v3128_v32, %v3128_v32  ;;  %v3152_v54 = vcombine.low %v3128_v32, %v3128_v32  ;;  %v493_v56 = vsel %vm2905_vm2, %v3128_v32, 0.0  ;;  %v3177_v15 = vsel %vm2892_vm0, %v3128_v32, 0.0 }
  0x29   : > { %v1253_v61 = vrot.slane %v493_v56, 4  ;;  %v2391_v0 = vpack.i.bf16 %v2993_v46, %v3177_v15  ;;  %v3806_v26 = vrot.slane %v3177_v15, 4  ;;  %v2481_v46 = vpack.i.bf16 %v3023_v53, %v2927_v20 }
  0x2a   : > { %v494_v58 = vsel %vm2911_vm3, %v3140_v50, 0.0  ;;  %v2386_v60 = vpack.i.bf16 %v3128_v32, %v3152_v54  ;;  %v475_v5 = vsel %vm2897_vm1, %v3140_v50, 0.0  ;;  %v2416_v14 = vpack.i.bf16 %v3140_v50, %v3128_v32 }
  0x2b   : > { %2277 = vrot.lane.b32.xlu0 %v2977_v40, %s2821_s9  ;;  %2282 = vrot.lane.b32.xlu1 %v2981_v41, %s2815_s27  ;;  %v1254_v62 = vrot.slane %v494_v58, 4  ;;  %v1238_v27 = vrot.slane %v475_v5, 4  ;;  %v3218_v30 = vpack.i.bf16 %v475_v5, %v3177_v15  ;;  %v2506_v34 = vpack.i.bf16 %v3023_v53, %v2988_v45 }
  0x2c   : > { %vm673_vm0 = vcmask 121856   ;;  %vm663_vm1 = vcmask 130048   ;;  %vm681_vm2 = vcmask 7168   ;;  %vm2830_vm3 = vmmov 0  }
  0x2d   : > { %v3172_v11 = vpack.i.bf16 %v1254_v62, %v1253_v61  ;;  %v3206_v9 = vpack.i.bf16 %v1238_v27, %v3806_v26 }
  0x2f   : > { %2287 = vrot.lane.b32.xlu0 %v2984_v44, %s2820_s8  ;;  %2292 = vrot.lane.b32.xlu1 %v3019_v52, %s2817_s29 }
  0x33   : > { %2297 = vrot.lane.b32.xlu0 %v2945_v33, %s2814_s26  ;;  %2302 = vrot.lane.b32.xlu1 %v2301_v2, %s2823_s13  ;;  %v3185_v2 = vpack.i.bf16 %v494_v58, %v493_v56 }
  0x37   : > { %2307 = vrot.lane.b32.xlu0 %v3066_v8, %s2824_s14  ;;  %2312 = vrot.lane.b32.xlu1 %v3068_v12, %s2825_s15 }
  0x3b   : > { %2317 = vrot.lane.b32.xlu0 %v3077_v17, %s2826_s16  ;;  %2322 = vrot.lane.b32.xlu1 %v3081_v18, %s2827_s17 }
  0x3f   : > { %2327 = vrot.lane.b32.xlu0 %v3058_v7, %s2828_s24  ;;  %2332 = vrot.lane.b32.xlu1 %v3092_v21, %s2829_s7 }
  0x43   : > { %2337 = vrot.lane.b32.xlu0 %v3068_v12, %s2814_s26  ;;  %2347 = vrot.lane.b32.xlu1 %v3108_v24, %s2824_s14 }
  0x47   : > { %2342 = vrot.lane.b32.xlu0 %v3058_v7, %s2814_s26  ;;  %2357 = vrot.lane.b32.xlu1 %v3126_v29, %s2826_s16 }
  0x4b   : > { %2352 = vrot.lane.b32.xlu0 %v3134_v36, %s2825_s15  ;;  %2367 = vrot.lane.b32.xlu1 %v3136_v43, %s2828_s24 }
  0x4f   : > { %2362 = vrot.lane.b32.xlu0 %v3148_v51, %s2827_s17  ;;  %2377 = vrot.lane.b32.xlu1 %v3134_v36, %s2814_s26 }
  0x53   : > { %2372 = vrot.lane.b32.xlu0 %v3165_v59, %s2829_s7  ;;  %2387 = vrot.lane.b32.xlu1 %v2386_v60, %s2824_s14 }
  0x57   : > { %2382 = vrot.lane.b32.xlu0 %v3136_v43, %s2814_s26  ;;  %2397 = vrot.lane.b32.xlu1 %v3172_v11, %s2814_s26 }
  0x5b   : > { %2392 = vrot.lane.b32.xlu0 %v2391_v0, %s2823_s13  ;;  %2407 = vrot.lane.b32.xlu1 %v3185_v2, %s2825_s15 }
  0x5f   : > { %2402 = vrot.lane.b32.xlu0 %v2401_v23, %s2824_s14  ;;  %2417 = vrot.lane.b32.xlu1 %v2416_v14, %s2827_s17 }
  0x63   : > { %2412 = vrot.lane.b32.xlu0 %v3206_v9, %s2826_s16  ;;  %2427 = vrot.lane.b32.xlu1 %v3036_v57, %s2825_s15 }
  0x67   : > { %2422 = vrot.lane.b32.xlu0 %v3172_v11, %s2828_s24  ;;  %2437 = vrot.lane.b32.xlu1 %v2436_v28, %s2827_s17 }
  0x6b   : > { %2432 = vrot.lane.b32.xlu0 %v3044_v1, %s2826_s16  ;;  %2447 = vrot.lane.b32.xlu1 %v3218_v30, %s2829_s7 }
  0x6f   : > { %2442 = vrot.lane.b32.xlu0 %v3052_v3, %s2828_s24  ;;  %2457 = vrot.lane.b32.xlu1 %v2456_v63, %s2829_s7 }
  0x73   : > { %2452 = vrot.lane.b32.xlu0 %v3185_v2, %s2814_s26  ;;  %2467 = vrot.lane.b32.xlu1 %v2466_v37, %s2814_s26 }
  0x77   : > { %2462 = vrot.lane.b32.xlu0 %v3036_v57, %s2814_s26  ;;  %2477 = vrot.lane.b32.xlu1 %v3019_v52, %s2821_s9 }
  0x7b   : > { %2472 = vrot.lane.b32.xlu0 %v2984_v44, %s2818_s30  ;;  %2487 = vrot.lane.b32.xlu1 %v2945_v33, %s2820_s8 }
  0x7f   : > { %2482 = vrot.lane.b32.xlu0 %v2481_v46, %s2815_s27  ;;  %2497 = vrot.lane.b32.xlu1 %v2981_v41, %s2816_s28 }
  0x83   : > { %2492 = vrot.lane.b32.xlu0 %v2977_v40, %s2817_s29  ;;  %2507 = vrot.lane.b32.xlu1 %v2506_v34, %s2814_s26 }
  0x87   : > { %2502 = vrot.lane.b32.xlu0 %v2984_v44, %s2819_s6  ;;  %2517 = vrot.lane.b32.xlu1 %v3092_v21, %s2821_s9 }
  0x89   : > { %v2228_v33 = vpop.permute.xlu0 %2227  ;;  %v2233_v47 = vpop.permute.xlu1 %2232 }
  0x8a   : > { %v2230_v55 = vunpack.i.h.bf16 %v2228_v33  ;;  %v2229_v40 = vunpack.i.l.bf16 %v2228_v33  ;;  %v2235_v63 = vunpack.i.h.bf16 %v2233_v47  ;;  %v2234_v1 = vunpack.i.l.bf16 %v2233_v47 }
  0x8b   : > { %2512 = vrot.lane.b32.xlu0 %v3058_v7, %s2818_s30  ;;  %2527 = vrot.lane.b32.xlu1 %v3068_v12, %s2820_s8 }
  0x8c   : > { %v504_v3 = vsel %vm503_vm4, %v2229_v40, %v2230_v55  ;;  %v531_v37 = vsel %vm530_vm6, %v2234_v1, %v2235_v63 }
  0x8d   : > { %v2238_v41 = vpop.permute.xlu0 %2237  ;;  %v2248_v52 = vpop.permute.xlu1 %2247  ;;  %v610_v28 = vsel %vm609_vm5, %v2903_v10, %v504_v3 }
  0x8e   : > { %v2250_v31 = vunpack.i.h.bf16 %v2248_v52  ;;  %v2249_v56 = vunpack.i.l.bf16 %v2248_v52  ;;  %v2239_v61 = vunpack.i.l.bf16 %v2238_v41 }
  0x8f   : > { %2522 = vrot.lane.b32.xlu0 %v3081_v18, %s2815_s27  ;;  %v2240_v18 = vunpack.i.h.bf16 %v2238_v41 }
  0x90   : > { %v547_v47 = vsel %vm546_vm7, %v2249_v56, %v2250_v31 }
  0x91   : > { %v2243_v44 = vpop.permute.xlu0 %2242  ;;  %v2253_v57 = vpop.permute.xlu1 %2252 }
  0x92   : > { %v2245_v58 = vunpack.i.h.bf16 %v2243_v44  ;;  %v2244_v60 = vunpack.i.l.bf16 %v2243_v44  ;;  %v2255_v41 = vunpack.i.h.bf16 %v2253_v57  ;;  %v2254_v52 = vunpack.i.l.bf16 %v2253_v57 }
  0x93   : > { %2532 = vrot.lane.b32.xlu0 %v3077_v17, %s2817_s29 }
  0x94   : > { %v513_v46 = vsel %vm512_vm9, %v2244_v60, %v2245_v58 }
  0x95   : > { %v2263_v62 = vpop.permute.xlu0 %2262  ;;  %v2258_v0 = vpop.permute.xlu1 %2257 }
  0x96   : > { %v2265_v5 = vunpack.i.h.bf16 %v2263_v62  ;;  %v2264_v14 = vunpack.i.l.bf16 %v2263_v62  ;;  %v2260_v23 = vunpack.i.h.bf16 %v2258_v0  ;;  %v2259_v27 = vunpack.i.l.bf16 %v2258_v0 }
  0x97   : > { %v554_v62 = vsel %vm553_vm8, %v2239_v61, %v2240_v18 }
  0x98   : > { %v524_v34 = vsel %vm523_vm10, %v2259_v27, %v2260_v23  ;;  %v540_v33 = vsel %vm539_vm11, %v2264_v14, %v2265_v5  ;;  %v613_v56 = vsel %vm609_vm5, %v547_v47, %v554_v62  ;;  %v561_v5 = vsel %vm560_vm12, %v2254_v52, %v2255_v41 }
  0x99   : > { %v3273_v55 = vpop.permute.xlu0 %2267  ;;  %v2273_v40 = vpop.permute.xlu1 %2272  ;;  %v611_v44 = vsel %vm609_vm5, %v513_v46, %v524_v34  ;;  %v612_v60 = vsel %vm609_vm5, %v531_v37, %v540_v33  ;;  %v614_v33 = vsel %vm609_vm5, %v561_v5, %v564_v42 }
  0x9a   : > { %v2270_v10 = vunpack.i.h.bf16 %v3273_v55  ;;  %v2269_v63 = vunpack.i.l.bf16 %v3273_v55  ;;  %v2275_v1 = vunpack.i.h.bf16 %v2273_v40  ;;  %v2274_v3 = vunpack.i.l.bf16 %v2273_v40 }
  0x9b   : > { %v2093_v58 = vpack.c.bf16 %v611_v44, %v610_v28  ;;  %v2096_v0 = vpack.c.bf16 %v613_v56, %v612_v60 }
  0x9c   : > { %v570_v18 = vsel %vm503_vm4, %v2269_v63, %v2270_v10  ;;  %v580_v61 = vsel %vm512_vm9, %v2274_v3, %v2275_v1 }
  0x9d   : > { %2094 = vmatpush3.bf16.msra.mxu0 %v2093_v58  ;;  %v2278_v31 = vpop.permute.xlu0 %2277  ;;  %v3280_v57 = vpop.permute.xlu1 %2282  ;;  %v615_v37 = vsel %vm609_vm5, %v570_v18, %v580_v61 }
  0x9e   : > { %2095 = vmatprep.subr.bf16.mxu0 %v2822_v6  ;;  %v2280_v14 = vunpack.i.h.bf16 %v2278_v31  ;;  %v2279_v23 = vunpack.i.l.bf16 %v2278_v31  ;;  %v2285_v27 = vunpack.i.h.bf16 %v3280_v57  ;;  %v2284_v28 = vunpack.i.l.bf16 %v3280_v57 }
  0x9f   : > { %v2099_v41 = vpack.c.bf16 %v615_v37, %v614_v33 }
  0xa0   : > { %v587_v52 = vsel %vm523_vm10, %v2279_v23, %v2280_v14  ;;  %v594_v10 = vsel %vm530_vm6, %v2284_v28, %v2285_v27 }
  0xa1   : > { %2097 = vmatpush3.bf16.msra.mxu0 %v2096_v0  ;;  %v2288_v46 = vpop.permute.xlu0 %2287  ;;  %v2293_v34 = vpop.permute.xlu1 %2292  ;;  %v616_v31 = vsel %vm609_vm5, %v587_v52, %v594_v10 }
  0xa2   : > { %v2290_v47 = vunpack.i.h.bf16 %v2288_v46  ;;  %v2289_v40 = vunpack.i.l.bf16 %v2288_v46  ;;  %v2295_v44 = vunpack.i.h.bf16 %v2293_v34  ;;  %v2294_v62 = vunpack.i.l.bf16 %v2293_v34  ;;  %2098 = vmatprep.subr.bf16.mxu0 %v2822_v6 }
  0xa4   : > { %v600_v1 = vsel %vm539_vm11, %v2289_v40, %v2290_v47  ;;  %v607_v3 = vsel %vm546_vm7, %v2294_v62, %v2295_v44 }
  0xa5   : > { %2100 = vmatpush3.bf16.msra.mxu0 %v2099_v41  ;;  %v2298_v58 = vpop.permute.xlu0 %2297  ;;  %v2303_v42 = vpop.permute.xlu1 %2302  ;;  %v617_v60 = vsel %vm609_vm5, %v600_v1, %v607_v3 }
  0xa6   : > { %2101 = vmatprep.subr.bf16.mxu0 %v2822_v6  ;;  %v2102_v56 = vpack.c.bf16 %v617_v60, %v616_v31  ;;  %v2304_v0 = vunpack.i.l.bf16 %v2303_v42  ;;  %v2300_v44 = vunpack.i.h.bf16 %v2298_v58  ;;  %v2299_v62 = vunpack.i.l.bf16 %v2298_v58 }
  0xa7   : > { %v2305_v10 = vunpack.i.h.bf16 %v2303_v42 }
  0xa8   : > { %v622_v42 = vsel %vm503_vm4, %v2299_v62, %v2300_v44 }
  0xa9   : > { %2103 = vmatpush3.bf16.msra.mxu0 %v2102_v56  ;;  %v2308_v18 = vpop.permute.xlu0 %2307  ;;  %v3305_v61 = vpop.permute.xlu1 %2312  ;;  %v691_v62 = vsel %vm609_vm5, %v2916_v16, %v622_v42 }
  0xaa   : > { %v2310_v5 = vunpack.i.h.bf16 %v2308_v18  ;;  %v2309_v14 = vunpack.i.l.bf16 %v2308_v18  ;;  %2104 = vmatprep.subr.bf16.mxu0 %v2822_v6 }
  0xac   : > { %v635_v23 = vsel %vm634_vm13, %v2309_v14, %v2310_v5  ;;  %v693_v28 = vsel %vm609_vm5, %v2304_v0, %v2309_v14 }
  0xad   : > { %v2318_v37 = vpop.permute.xlu0 %2317  ;;  %v2323_v46 = vpop.permute.xlu1 %2322  ;;  %v694_v34 = vsel %vm609_vm5, %v2304_v0, %v635_v23 }
  0xae   : > { %v2536_v33 = vpack.i.bf16 %v694_v34, %v693_v28  ;;  %v2320_v60 = vunpack.i.h.bf16 %v2318_v37  ;;  %v2319_v31 = vunpack.i.l.bf16 %v2318_v37  ;;  %v2315_v28 = vunpack.i.h.bf16 %v3305_v61 }
  0xaf   : > { %v2314_v37 = vunpack.i.l.bf16 %v3305_v61  ;;  %v2324_v26 = vunpack.i.l.bf16 %v2323_v46 }
  0xb0   : > { %2537 = vrot.lane.b32.xlu1 %v2536_v33, %s2816_s28 }
  0xb1   : > { %v2328_v47 = vpop.permute.xlu0 %2327  ;;  %v3312_v40 = vpop.permute.xlu1 %2332  ;;  %v645_v16 = vsel %vm644_vm15, %v2314_v37, %v2315_v28 }
  0xb2   : > { %v2330_v0 = vunpack.i.h.bf16 %v2328_v47  ;;  %v2329_v5 = vunpack.i.l.bf16 %v2328_v47 }
  0xb5   : > { %v3314_v41 = vpop.permute.xlu0 %2337  ;;  %v2348_v52 = vpop.permute.xlu1 %2347 }
  0xb6   : > { %v2350_v1 = vunpack.i.h.bf16 %v2348_v52  ;;  %v2349_v3 = vunpack.i.l.bf16 %v2348_v52  ;;  %v692_v52 = vsel %vm609_vm5, %v2927_v20, %v2300_v44 }
  0xb7   : > { %v2546_v13 = vpack.i.bf16 %v692_v52, %v691_v62 }
  0xb8   : > { %v934_v56 = vsel %vm634_vm13, %v2349_v3, %v2350_v1  ;;  %v987_v18 = vsel %vm609_vm5, %v2305_v10, %v2349_v3  ;;  %v2325_v1 = vunpack.i.h.bf16 %v2323_v46  ;;  %v674_v46 = vsel %vm673_vm0, %v2329_v5, %v2330_v0 }
  0xb9   : > { %v2343_v14 = vpop.permute.xlu0 %2342  ;;  %v2358_v58 = vpop.permute.xlu1 %2357  ;;  %v988_v23 = vsel %vm609_vm5, %v2305_v10, %v934_v56  ;;  %v656_v10 = vsel %vm655_vm14, %v2319_v31, %v2320_v60  ;;  %v2335_v0 = vunpack.i.h.bf16 %v3312_v40 }
  0xba   : > { %v2345_v34 = vunpack.i.h.bf16 %v2343_v14  ;;  %v2344_v33 = vunpack.i.l.bf16 %v2343_v14  ;;  %v2541_v3 = vpack.i.bf16 %v988_v23, %v987_v18  ;;  %v2360_v56 = vunpack.i.h.bf16 %v2358_v58 }
  0xbb   : > { %v2359_v14 = vunpack.i.l.bf16 %v2358_v58  ;;  %v664_v60 = vsel %vm663_vm1, %v2324_v26, %v2325_v1  ;;  %v695_v58 = vsel %vm609_vm5, %v2314_v37, %v2319_v31  ;;  %v696_v42 = vsel %vm609_vm5, %v645_v16, %v656_v10 }
  0xbc   : > { %v922_v47 = vsel %vm503_vm4, %v2344_v33, %v2345_v34  ;;  %v986_v25 = vsel %vm609_vm5, %v2988_v45, %v2345_v34  ;;  %2542 = vrot.lane.b32.xlu1 %v2541_v3, %s2816_s28  ;;  %v697_v3 = vsel %vm609_vm5, %v2324_v26, %v2329_v5  ;;  %v2340_v37 = vunpack.i.h.bf16 %v3314_v41 }
  0xbd   : > { %v2353_v20 = vpop.permute.xlu0 %2352  ;;  %v2368_v44 = vpop.permute.xlu1 %2367  ;;  %v985_v61 = vsel %vm609_vm5, %v2968_v38, %v922_v47  ;;  %v698_v47 = vsel %vm609_vm5, %v664_v60, %v674_v46  ;;  %v2339_v1 = vunpack.i.l.bf16 %v3314_v41 }
  0xbe   : > { %v2355_v18 = vunpack.i.h.bf16 %v2353_v20  ;;  %v2354_v23 = vunpack.i.l.bf16 %v2353_v20  ;;  %v2370_v33 = vunpack.i.h.bf16 %v2368_v44  ;;  %v2369_v45 = vunpack.i.l.bf16 %v2368_v44 }
  0xbf   : > { %v2551_v34 = vpack.i.bf16 %v986_v25, %v985_v61  ;;  %v2334_v20 = vunpack.i.l.bf16 %v3312_v40  ;;  %v953_v44 = vsel %vm655_vm14, %v2359_v14, %v2360_v56  ;;  %v2556_v40 = vpack.i.bf16 %v696_v42, %v695_v58 }
  0xc0   : > { %v943_v25 = vsel %vm644_vm15, %v2354_v23, %v2355_v18  ;;  %2547 = vrot.lane.b32.xlu1 %v2546_v13, %s2816_s28  ;;  %v969_v52 = vsel %vm673_vm0, %v2369_v45, %v2370_v33  ;;  %v2561_v62 = vpack.i.bf16 %v698_v47, %v697_v3  ;;  %v989_v56 = vsel %vm609_vm5, %v2354_v23, %v2359_v14 }
  0xc1   : > { %2552 = vrot.lane.b32.xlu0 %v2551_v34, %s2816_s28  ;;  %v2363_v28 = vpop.permute.xlu0 %2362  ;;  %v2378_v31 = vpop.permute.xlu1 %2377  ;;  %v990_v61 = vsel %vm609_vm5, %v943_v25, %v953_v44  ;;  %v682_v46 = vsel %vm681_vm2, %v2334_v20, %v2335_v0  ;;  %v690_v47 = vsel %vm503_vm4, %v2339_v1, %v2340_v37  ;;  %v3809_v1 = vmov 0.0  }
  0xc2   : > { %v2365_v26 = vunpack.i.h.bf16 %v2363_v28  ;;  %v2364_v5 = vunpack.i.l.bf16 %v2363_v28  ;;  %v2380_v34 = vunpack.i.h.bf16 %v2378_v31  ;;  %v2379_v16 = vunpack.i.l.bf16 %v2378_v31  ;;  %1996 = vmatprep.mubr.msk.f32.mxu0 %vm2830_vm3, %v3809_v1  ;;  %2027 = vmatprep.mubr.msk.f32.mxu1 %vm2830_vm3, %v3809_v1 }
  0xc3   : > { %v2566_v14 = vpack.i.bf16 %v990_v61, %v989_v56  ;;  %v700_v3 = vsel %vm609_vm5, %v682_v46, %v2968_v38  ;;  %v2581_v38 = vpack.i.bf16 %v2340_v37, %v690_v47  ;;  %v2606_v46 = vpack.i.bf16 %v3096_v22, %v2971_v39 }
  0xc4   : > { %v960_v10 = vsel %vm663_vm1, %v2364_v5, %v2365_v26  ;;  %v991_v13 = vsel %vm609_vm5, %v2364_v5, %v2369_v45  ;;  %2562 = vrot.lane.b32.xlu1 %v2561_v62, %s2816_s28  ;;  %v699_v45 = vsel %vm609_vm5, %v2334_v20, %v3023_v53  ;;  %v984_v25 = vsel %vm503_vm4, %v2379_v16, %v2380_v34 }
  0xc5   : > { %2557 = vrot.lane.b32.xlu0 %v2556_v40, %s2816_s28  ;;  %v2373_v18 = vpop.permute.xlu0 %2372  ;;  %v3356_v33 = vpop.permute.xlu1 %2387  ;;  %v992_v41 = vsel %vm609_vm5, %v960_v10, %v969_v52  ;;  %v2576_v20 = vpack.i.bf16 %v700_v3, %v699_v45  ;;  %v2591_v31 = vpack.i.bf16 %v2380_v34, %v984_v25 }
  0xc6   : > { %v2375_v60 = vunpack.i.h.bf16 %v2373_v18  ;;  %v2374_v58 = vunpack.i.l.bf16 %v2373_v18  ;;  %v2571_v23 = vpack.i.bf16 %v992_v41, %v991_v13 }
  0xc8   : > { %v976_v42 = vsel %vm681_vm2, %v2374_v58, %v2375_v60  ;;  %2572 = vrot.lane.b32.xlu1 %v2571_v23, %s2816_s28  ;;  %v993_v28 = vsel %vm609_vm5, %v2374_v58, %v3096_v22 }
  0xc9   : > { %2567 = vrot.lane.b32.xlu0 %v2566_v14, %s2816_s28  ;;  %v3367_v0 = vpop.permute.xlu0 %2382  ;;  %v3369_v44 = vpop.permute.xlu1 %2397  ;;  %v994_v53 = vsel %vm609_vm5, %v976_v42, %v2971_v39 }
  0xca   : > { %v2586_v5 = vpack.i.bf16 %v994_v53, %v993_v28 }
  0xcc   : > { %2582 = vrot.lane.b32.xlu1 %v2581_v38, %s2816_s28 }
  0xcd   : > { %2577 = vrot.lane.b32.xlu0 %v2576_v20, %s2816_s28  ;;  %v3378_v52 = vpop.permute.xlu0 %2392  ;;  %v3380_v26 = vpop.permute.xlu1 %2407 }
  0xce   : > { %v2410_v37 = vunpack.i.h.bf16 %v3380_v26  ;;  %v2409_v40 = vunpack.i.l.bf16 %v3380_v26 }
  0xd0   : > { %2592 = vrot.lane.b32.xlu1 %v2591_v31, %s2816_s28  ;;  %v1233_v56 = vsel %vm644_vm15, %v2409_v40, %v2410_v37 }
  0xd1   : > { %2587 = vrot.lane.b32.xlu0 %v2586_v5, %s2816_s28  ;;  %v3390_v62 = vpop.permute.xlu0 %2402  ;;  %v3392_v10 = vpop.permute.xlu1 %2417 }
  0xd2   : > { %v2420_v18 = vunpack.i.h.bf16 %v3392_v10  ;;  %v2419_v41 = vunpack.i.l.bf16 %v3392_v10 }
  0xd4   : > { %2602 = vrot.lane.b32.xlu1 %v3077_v17, %s2821_s9  ;;  %v1250_v42 = vsel %vm663_vm1, %v2419_v41, %v2420_v18 }
  0xd5   : > { %2597 = vrot.lane.b32.xlu0 %v3068_v12, %s2818_s30  ;;  %v3401_v61 = vpop.permute.xlu0 %2412  ;;  %v3403_v13 = vpop.permute.xlu1 %2427 }
  0xd6   : > { %v2415_v34 = vunpack.i.h.bf16 %v3401_v61  ;;  %v2414_v16 = vunpack.i.l.bf16 %v3401_v61  ;;  %v2430_v58 = vunpack.i.h.bf16 %v3403_v13  ;;  %v2429_v14 = vunpack.i.l.bf16 %v3403_v13 }
  0xd8   : > { %v1243_v60 = vsel %vm655_vm14, %v2414_v16, %v2415_v34  ;;  %2612 = vrot.lane.b32.xlu1 %v3134_v36, %s2818_s30  ;;  %v1523_v25 = vsel %vm644_vm15, %v2429_v14, %v2430_v58  ;;  %vm746_vm15 = vcmask 883712  }
  0xd9   : > { %v3415_v17 = vsel %vm609_vm5, %v1233_v56, %v1243_v60  ;;  %2607 = vrot.lane.b32.xlu0 %v2606_v46, %s2814_s26  ;;  %v3422_v39 = vpop.permute.xlu0 %2422  ;;  %v3424_v23 = vpop.permute.xlu1 %2437 }
  0xda   : > { %v2425_v45 = vunpack.i.h.bf16 %v3422_v39  ;;  %v2424_v3 = vunpack.i.l.bf16 %v3422_v39  ;;  %v2440_v38 = vunpack.i.h.bf16 %v3424_v23  ;;  %v3811_v31 = vunpack.i.l.bf16 %v3424_v23 }
  0xdc   : > { %v1259_v47 = vsel %vm673_vm0, %v2424_v3, %v2425_v45  ;;  %2622 = vrot.lane.b32.xlu1 %v3058_v7, %s2820_s8  ;;  %v1540_v34 = vsel %vm663_vm1, %v3811_v31, %v2440_v38 }
  0xdd   : > { %v3438_v28 = vsel %vm609_vm5, %v1250_v42, %v1259_v47  ;;  %2617 = vrot.lane.b32.xlu0 %v3126_v29, %s2821_s9  ;;  %v3444_v53 = vpop.permute.xlu0 %2432  ;;  %v3446_v20 = vpop.permute.xlu1 %2447 }
  0xde   : > { %v2435_v5 = vunpack.i.h.bf16 %v3444_v53  ;;  %v2434_v37 = vunpack.i.l.bf16 %v3444_v53 }
  0xe0   : > { %v1533_v56 = vsel %vm655_vm14, %v2434_v37, %v2435_v5  ;;  %2632 = vrot.lane.b32.xlu1 %v3066_v8, %s2816_s28  ;;  %v1569_v10 = vsel %vm609_vm5, %v2429_v14, %v2434_v37 }
  0xe1   : > { %v3456_v46 = vsel %vm609_vm5, %v1523_v25, %v1533_v56  ;;  %2627 = vrot.lane.b32.xlu0 %v3092_v21, %s2817_s29  ;;  %v3462_v7 = vpop.permute.xlu0 %2442  ;;  %v3464_v18 = vpop.permute.xlu1 %2457  ;;  %v2661_v25 = vpack.i.bf16 %v3128_v32, %v3085_v19 }
  0xe2   : > { %v2445_v60 = vunpack.i.h.bf16 %v3462_v7  ;;  %v3812_v58 = vunpack.i.l.bf16 %v3462_v7  ;;  %v3822_v61 = vunpack.i.l.bf16 %v3462_v7  ;;  %v2459_v53 = vunpack.i.l.bf16 %v3464_v18 }
  0xe3   : > { %v2746_v13 = vpack.i.bf16 %v3456_v46, %v1569_v10 }
  0xe4   : > { %v1549_v42 = vsel %vm673_vm0, %v3812_v58, %v2445_v60  ;;  %2642 = vrot.lane.b32.xlu1 %v3136_v43, %s2820_s8 }
  0xe5   : > { %v3475_v21 = vsel %vm609_vm5, %v1540_v34, %v1549_v42  ;;  %2637 = vrot.lane.b32.xlu0 %v3148_v51, %s2815_s27  ;;  %v3481_v8 = vpop.permute.xlu0 %2452  ;;  %v3483_v45 = vpop.permute.xlu1 %2467 }
  0xe6   : > { %v2469_v51 = vunpack.i.l.bf16 %v3483_v45  ;;  %v2455_v39 = vunpack.i.h.bf16 %v3481_v8 }
  0xe8   : > { %2652 = vrot.lane.b32.xlu1 %v3108_v24, %s2816_s28  ;;  %v831_v24 = vsel %vm503_vm4, %v2469_v51, %v2269_v63 }
  0xe9   : > { %2647 = vrot.lane.b32.xlu0 %v3165_v59, %s2817_s29  ;;  %v3489_v47 = vpop.permute.xlu0 %2462  ;;  %v2478_v38 = vpop.permute.xlu1 %2477 }
  0xea   : > { %v2480_v5 = vunpack.i.h.bf16 %v2478_v38  ;;  %v2479_v56 = vunpack.i.l.bf16 %v2478_v38  ;;  %v2465_v7 = vunpack.i.h.bf16 %v3489_v47 }
  0xec   : > { %2662 = vrot.lane.b32.xlu1 %v2661_v25, %s2814_s26  ;;  %v843_v31 = vsel %vm523_vm10, %v2479_v56, %v2480_v5 }
  0xed   : > { %2657 = vrot.lane.b32.xlu0 %v3068_v12, %s2819_s6  ;;  %v2473_v34 = vpop.permute.xlu0 %2472  ;;  %v2488_v60 = vpop.permute.xlu1 %2487 }
  0xee   : > { %v2475_v42 = vunpack.i.h.bf16 %v2473_v34  ;;  %v2474_v1 = vunpack.i.l.bf16 %v2473_v34  ;;  %v2490_v25 = vunpack.i.h.bf16 %v2488_v60  ;;  %v2489_v38 = vunpack.i.l.bf16 %v2488_v60 }
  0xef   : > { %v910_v34 = vsel %vm609_vm5, %v2959_v35, %v831_v24 }
  0xf0   : > { %v837_v58 = vsel %vm512_vm9, %v2474_v1, %v2475_v42  ;;  %2672 = vrot.lane.b32.xlu1 %v3134_v36, %s2819_s6  ;;  %v853_v60 = vsel %vm539_vm11, %v2489_v38, %v2490_v25  ;;  %v2390_v38 = vunpack.i.h.bf16 %v3356_v33  ;;  %s1889_s6 = sshll.u32 %s3834_s18, 3 }
  0xf1   : > { %2667 = vrot.lane.b32.xlu0 %v3136_v43, %s2818_s30  ;;  %v3506_v12 = vpop.permute.xlu0 %2482  ;;  %v911_v55 = vsel %vm609_vm5, %v837_v58, %v843_v31  ;;  %v2498_v63 = vpop.permute.xlu1 %2497  ;;  %v2470_v43 = vunpack.i.h.bf16 %v3483_v45  ;;  %v2686_v31 = vpack.i.bf16 %v3152_v54, %v3096_v22 }
  0xf2   : > { %v2484_v51 = vunpack.i.l.bf16 %v3506_v12  ;;  %v2115_v5 = vpack.c.bf16 %v911_v55, %v910_v34  ;;  %v2500_v1 = vunpack.i.h.bf16 %v2498_v63  ;;  %v2499_v56 = vunpack.i.l.bf16 %v2498_v63 }
  0xf4   : > { %2116 = vmatpush3.bf16.msra.mxu1 %v2115_v5  ;;  %v847_v42 = vsel %vm530_vm6, %v2285_v27, %v2484_v51  ;;  %2677 = vrot.lane.b32.xlu1 %v3172_v11, %s2818_s30  ;;  %v865_v34 = vsel %vm553_vm8, %v2499_v56, %v2500_v1  ;;  %v2389_v11 = vunpack.i.l.bf16 %v3356_v33 }
  0xf5   : > { %1456 = vrot.lane.b32.xlu0 %v3140_v50, %s2814_s26  ;;  %v2493_v35 = vpop.permute.xlu0 %2492  ;;  %v2508_v58 = vpop.permute.xlu1 %2507  ;;  %2117 = vmatprep.subr.bf16.mxu1 %v2822_v6  ;;  %v912_v22 = vsel %vm609_vm5, %v847_v42, %v853_v60  ;;  %v2400_v60 = vunpack.i.h.bf16 %v3369_v44 }
  0xf6   : > { %v2495_v24 = vunpack.i.h.bf16 %v2493_v35  ;;  %v2494_v45 = vunpack.i.l.bf16 %v2493_v35  ;;  %v2510_v57 = vunpack.i.h.bf16 %v2508_v58  ;;  %v2509_v35 = vunpack.i.l.bf16 %v2508_v58 }
  0xf8   : > { %v859_v27 = vsel %vm546_vm7, %v2494_v45, %v2495_v24  ;;  %v3527_v25 = vsel %vm503_vm4, %v2510_v57, %v2470_v43  ;;  %2687 = vrot.lane.b32.xlu1 %v2686_v31, %s2815_s27  ;;  %v2385_v24 = vunpack.i.h.bf16 %v3367_v0  ;;  %v2384_v45 = vunpack.i.l.bf16 %v3367_v0 }
  0xf9   : > { %2682 = vrot.lane.b32.xlu0 %v3165_v59, %s2821_s9  ;;  %v913_v55 = vsel %vm609_vm5, %v859_v27, %v865_v34  ;;  %v2503_v63 = vpop.permute.xlu0 %2502  ;;  %v2518_v51 = vpop.permute.xlu1 %2517  ;;  %v1224_v59 = vsel %vm634_vm13, %v2389_v11, %v2390_v38  ;;  %v878_v34 = vsel %vm503_vm4, %v2470_v43, %v2509_v35  ;;  %v2399_v27 = vunpack.i.l.bf16 %v3369_v44 }
  0xfa   : > { %v2118_v5 = vpack.c.bf16 %v913_v55, %v912_v22  ;;  %v2505_v1 = vunpack.i.h.bf16 %v2503_v63  ;;  %v2504_v56 = vunpack.i.l.bf16 %v2503_v63  ;;  %v1212_v57 = vsel %vm503_vm4, %v2384_v45, %v2385_v24 }
  0xfb   : > { %v2394_v38 = vunpack.i.l.bf16 %v3378_v52  ;;  %v2485_v22 = vunpack.i.h.bf16 %v3506_v12  ;;  %v2520_v63 = vunpack.i.h.bf16 %v2518_v51  ;;  %v2519_v43 = vunpack.i.l.bf16 %v2518_v51 }
  0xfc   : > { %2119 = vmatpush3.bf16.msra.mxu1 %v2118_v5  ;;  %v871_v33 = vsel %vm560_vm12, %v2504_v56, %v2505_v1  ;;  %2697 = vrot.lane.b32.xlu1 %v3126_v29, %s2817_s29  ;;  %v2405_v5 = vunpack.i.h.bf16 %v3390_v62  ;;  %v2404_v1 = vunpack.i.l.bf16 %v3390_v62  ;;  %v1276_v51 = vsel %vm609_vm5, %v3085_v19, %v2385_v24 }
  0xfd   : > { %2692 = vrot.lane.b32.xlu0 %v3134_v36, %s2820_s8  ;;  %v2513_v42 = vpop.permute.xlu0 %2512  ;;  %2120 = vmatprep.subr.bf16.mxu1 %v2822_v6  ;;  %v2528_v0 = vpop.permute.xlu1 %2527  ;;  %v3821_v36 = vrot.slane %v3002_v48, 4 }
  0xfe   : > { %v2515_v31 = vunpack.i.h.bf16 %v2513_v42  ;;  %v2514_v58 = vunpack.i.l.bf16 %v2513_v42  ;;  %v2530_v35 = vunpack.i.h.bf16 %v2528_v0  ;;  %v2529_v42 = vunpack.i.l.bf16 %v2528_v0 }
  0xff   : > { %v914_v29 = vsel %vm609_vm5, %v871_v33, %v3821_v36  ;;  %v1278_v36 = vsel %vm609_vm5, %v2394_v38, %v1224_v59  ;;  %v890_v0 = vsel %vm523_vm10, %v2519_v43, %v2520_v63  ;;  %v1514_v19 = vsel %vm634_vm13, %v2404_v1, %v2405_v5 }
 0x100   : > { %v884_v55 = vsel %vm512_vm9, %v2514_v58, %v2515_v31  ;;  %1474 = vrot.lane.b32.xlu1 %v3128_v32, %s2815_s27  ;;  %v2788_v31 = vld [vmem:[%s2890_s25 + $0x18] sm:$0xff]  ;;  %v2395_v58 = vunpack.i.h.bf16 %v3378_v52  ;;  %v902_v59 = vsel %vm539_vm11, %v2529_v42, %v2530_v35  ;;  %v2450_v35 = vunpack.i.h.bf16 %v3446_v20  ;;  %s1907_s27 = sshll.u32 %s3834_s18, 5 }
 0x101   : > { %2702 = vrot.lane.b32.xlu0 %v3218_v30, %s2821_s9  ;;  %v915_v44 = vsel %vm609_vm5, %v878_v34, %v884_v55  ;;  %v2523_v56 = vpop.permute.xlu0 %2522  ;;  %v1275_v62 = vsel %vm609_vm5, %v2788_v31, %v1212_v57  ;;  %v1277_v30 = vsel %vm609_vm5, %v2394_v38, %v2389_v11  ;;  %v1502_v55 = vsel %vm503_vm4, %v2399_v27, %v2400_v60  ;;  %s398_s30 = scalar_lea.vmem %s3804_s4, %s1907_s27 }
 0x102   : > { %v2121_v12 = vpack.c.bf16 %v915_v44, %v914_v29  ;;  %v2525_v45 = vunpack.i.h.bf16 %v2523_v56  ;;  %v2524_v33 = vunpack.i.l.bf16 %v2523_v56  ;;  %v2716_v57 = vpack.i.bf16 %v1276_v51, %v1275_v62 }
 0x103   : > { %v1566_v38 = vsel %vm609_vm5, %v3140_v50, %v2400_v60  ;;  %v2721_v27 = vpack.i.bf16 %v1278_v36, %v1277_v30  ;;  %v1567_v63 = vsel %vm609_vm5, %v2395_v58, %v2404_v1  ;;  %v1279_v56 = vsel %vm609_vm5, %v2409_v40, %v2414_v16 }
 0x104   : > { %2122 = vmatpush3.bf16.msra.mxu1 %v2121_v12  ;;  %v896_v34 = vsel %vm530_vm6, %v2485_v22, %v2524_v33  ;;  %v3571_v29 = vsel %vm530_vm6, %v2524_v33, %v2525_v45  ;;  %2712 = vrot.lane.b32.xlu1 %v3206_v9, %s2817_s29  ;;  %v1568_v9 = vsel %vm609_vm5, %v2395_v58, %v1514_v19  ;;  %v2449_v12 = vunpack.i.l.bf16 %v3446_v20 }
 0x105   : > { %2707 = vrot.lane.b32.xlu0 %v3185_v2, %s2820_s8  ;;  %v2533_v52 = vpop.permute.xlu0 %2532  ;;  %2123 = vmatprep.subr.bf16.mxu1 %v2822_v6  ;;  %v916_v22 = vsel %vm609_vm5, %v890_v0, %v896_v34  ;;  %v1565_v2 = vsel %vm609_vm5, %v3128_v32, %v1502_v55  ;;  %v2731_v60 = vpack.i.bf16 %v1568_v9, %v1567_v63  ;;  %vm2832_vm13 = vmmov 1  }
 0x106   : > { %v2535_v11 = vunpack.i.h.bf16 %v2533_v52  ;;  %v2534_v24 = vunpack.i.l.bf16 %v2533_v52  ;;  %v2726_v50 = vpack.i.bf16 %v1566_v38, %v1565_v2  ;;  %v1281_v1 = vsel %vm609_vm5, %v2419_v41, %v2424_v3  ;;  %vm3662_vm14 = vmpackc.low %vm609_vm5, %vm2832_vm13 }
 0x107   : > { %v2736_v26 = vpack.i.bf16 %v3415_v17, %v1279_v56  ;;  %v2741_v40 = vpack.i.bf16 %v3438_v28, %v1281_v1  ;;  %v3823_v41 = vunpack.i.l.bf16 %v3424_v23  ;;  %v2454_v3 = vunpack.i.l.bf16 %v3481_v8 }
 0x108   : > { %v908_v43 = vsel %vm546_vm7, %v2534_v24, %v2535_v11  ;;  %2722 = vrot.lane.b32.xlu1 %v2721_v27, %s2816_s28  ;;  %v1266_v17 = vsel %vm681_vm2, %v2449_v12, %v2450_v35  ;;  %v2460_v28 = vunpack.i.h.bf16 %v3464_v18  ;;  %v1283_v14 = vsel %vm609_vm5, %v2449_v12, %v3152_v54 }
 0x109   : > { %2717 = vrot.lane.b32.xlu0 %v2716_v57, %s2816_s28  ;;  %v917_v5 = vsel %vm609_vm5, %v902_v59, %v908_v43  ;;  %v1571_v16 = vsel %vm609_vm5, %v3823_v41, %v3822_v61  ;;  %v1284_v20 = vsel %vm609_vm5, %v1266_v17, %v3128_v32  ;;  %v1274_v37 = vsel %vm503_vm4, %v2454_v3, %v2455_v39 }
 0x10a   : > { %v2124_v44 = vpack.c.bf16 %v917_v5, %v916_v22  ;;  %v2751_v23 = vpack.i.bf16 %v3475_v21, %v1571_v16  ;;  %v2464_v18 = vunpack.i.l.bf16 %v3489_v47  ;;  %v1556_v8 = vsel %vm681_vm2, %v2459_v53, %v2460_v28  ;;  %v2789_v21 = vld [vmem:[%s2954_s12] sm:$0xff]  ;;  %s406_s12 = scalar_lea.vmem %s3805_s5, %s1889_s6 }
 0x10b   : > { %v2756_v46 = vpack.i.bf16 %v1284_v20, %v1283_v14  ;;  %v2761_v45 = vpack.i.bf16 %v2455_v39, %v1274_v37  ;;  %v1573_v54 = vsel %vm609_vm5, %v2459_v53, %v3189_v4  ;;  %v1574_v32 = vsel %vm609_vm5, %v1556_v8, %v2789_v21 }
 0x10c   : > { %2125 = vmatpush3.bf16.msra.mxu1 %v2124_v44  ;;  %2732 = vrot.lane.b32.xlu1 %v2731_v60, %s2816_s28  ;;  %v1564_v33 = vsel %vm503_vm4, %v2464_v18, %v2465_v7  ;;  %v2766_v47 = vpack.i.bf16 %v1574_v32, %v1573_v54  ;;  %v3672_v54 = vld [vmem:[%s3803_s3] sm:$0xff] }
 0x10d   : > { %2727 = vrot.lane.b32.xlu0 %v2726_v50, %s2816_s28  ;;  %2126 = vmatprep.subr.bf16.mxu1 %v2822_v6  ;;  %v2771_v42 = vpack.i.bf16 %v2465_v7, %v1564_v33 }
 0x110   : > { %2742 = vrot.lane.b32.xlu1 %v2741_v40, %s2816_s28 }
 0x111   : > { %2737 = vrot.lane.b32.xlu0 %v2736_v26, %s2816_s28 }
 0x114   : > { %2752 = vrot.lane.b32.xlu1 %v2751_v23, %s2816_s28 }
 0x115   : > { %2747 = vrot.lane.b32.xlu0 %v2746_v13, %s2816_s28 }
 0x118   : > { %2762 = vrot.lane.b32.xlu1 %v2761_v45, %s2816_s28 }
 0x119   : > { %2757 = vrot.lane.b32.xlu0 %v2756_v46, %s2816_s28 }
 0x11c   : > { %2772 = vrot.lane.b32.xlu1 %v2771_v42, %s2816_s28 }
 0x11d   : > { %2767 = vrot.lane.b32.xlu0 %v2766_v47, %s2816_s28 }
 0x122   : > { %v2538_v51 = vpop.permute.xlu1 %2537 }
 0x123   : > { %v2540_v62 = vunpack.i.h.bf16 %v2538_v51  ;;  %v2539_v58 = vunpack.i.l.bf16 %v2538_v51 }
 0x125   : > { %v736_v24 = vsel %vm553_vm8, %v2539_v58, %v2540_v62 }
 0x12e   : > { %v2543_v31 = vpop.permute.xlu1 %2542 }
 0x12f   : > { %v2545_v4 = vunpack.i.h.bf16 %v2543_v31  ;;  %v2544_v30 = vunpack.i.l.bf16 %v2543_v31 }
 0x131   : > { %v1030_v57 = vsel %vm553_vm8, %v2544_v30, %v2545_v4  ;;  %v3826_v4 = vmov 0.0  }
 0x132   : > { %v2548_v34 = vpop.permute.xlu1 %2547 }
 0x133   : > { %v2553_v36 = vpop.permute.xlu0 %2552  ;;  %v2550_v19 = vunpack.i.h.bf16 %v2548_v34  ;;  %v2549_v52 = vunpack.i.l.bf16 %v2548_v34 }
 0x134   : > { %v2555_v0 = vunpack.i.h.bf16 %v2553_v36  ;;  %v2554_v55 = vunpack.i.l.bf16 %v2553_v36 }
 0x135   : > { %v735_v11 = vsel %vm553_vm8, %v2549_v52, %v2550_v19 }
 0x136   : > { %v1029_v59 = vsel %vm553_vm8, %v2554_v55, %v2555_v0  ;;  %v2563_v27 = vpop.permute.xlu1 %2562  ;;  %v2105_v22 = vpack.c.bf16 %v736_v24, %v735_v11  ;;  %v1200_v11 = vsel %vm609_vm5, %v3002_v48, %v3527_v25 }
 0x137   : > { %v2558_v38 = vpop.permute.xlu0 %2557  ;;  %v2127_v2 = vpack.c.bf16 %v1030_v57, %v1029_v59  ;;  %v2565_v43 = vunpack.i.h.bf16 %v2563_v27  ;;  %v2564_v5 = vunpack.i.l.bf16 %v2563_v27 }
 0x138   : > { %v2560_v63 = vunpack.i.h.bf16 %v2558_v38  ;;  %v2559_v9 = vunpack.i.l.bf16 %v2558_v38  ;;  %2106 = vmatpush3.bf16.msra.mxu0 %v2105_v22 }
 0x139   : > { %2128 = vmatpush3.bf16.msra.mxu1 %v2127_v2  ;;  %2107 = vmatprep.subr.bf16.mxu0 %v2822_v6  ;;  %v738_v50 = vsel %vm553_vm8, %v2564_v5, %v2565_v43 }
 0x13a   : > { %v737_v44 = vsel %vm553_vm8, %v2559_v9, %v2560_v63  ;;  %2129 = vmatprep.subr.bf16.mxu1 %v2822_v6  ;;  %v2573_v56 = vpop.permute.xlu1 %2572 }
 0x13b   : > { %v2568_v60 = vpop.permute.xlu0 %2567  ;;  %v2108_v1 = vpack.c.bf16 %v738_v50, %v737_v44  ;;  %v2575_v26 = vunpack.i.h.bf16 %v2573_v56  ;;  %v2574_v40 = vunpack.i.l.bf16 %v2573_v56 }
 0x13c   : > { %v2570_v35 = vunpack.i.h.bf16 %v2568_v60  ;;  %v2569_v12 = vunpack.i.l.bf16 %v2568_v60 }
 0x13d   : > { %2109 = vmatpush3.bf16.msra.mxu0 %v2108_v1  ;;  %v1032_v61 = vsel %vm553_vm8, %v2574_v40, %v2575_v26 }
 0x13e   : > { %v1031_v10 = vsel %vm553_vm8, %v2569_v12, %v2570_v35  ;;  %2110 = vmatprep.subr.bf16.mxu0 %v2822_v6  ;;  %v2583_v16 = vpop.permute.xlu1 %2582 }
 0x13f   : > { %v2578_v41 = vpop.permute.xlu0 %2577  ;;  %v2130_v39 = vpack.c.bf16 %v1032_v61, %v1031_v10  ;;  %v2585_v28 = vunpack.i.h.bf16 %v2583_v16  ;;  %v2584_v53 = vunpack.i.l.bf16 %v2583_v16 }
 0x140   : > { %v2580_v3 = vunpack.i.h.bf16 %v2578_v41  ;;  %v2579_v17 = vunpack.i.l.bf16 %v2578_v41 }
 0x141   : > { %2131 = vmatpush3.bf16.msra.mxu1 %v2130_v39  ;;  %v740_v14 = vsel %vm553_vm8, %v2584_v53, %v2585_v28 }
 0x142   : > { %v739_v13 = vsel %vm553_vm8, %v2579_v17, %v2580_v3  ;;  %2132 = vmatprep.subr.bf16.mxu1 %v2822_v6  ;;  %v2593_v7 = vpop.permute.xlu1 %2592 }
 0x143   : > { %v2111_v20 = vpack.c.bf16 %v740_v14, %v739_v13  ;;  %v2588_v37 = vpop.permute.xlu0 %2587  ;;  %v2595_v46 = vunpack.i.h.bf16 %v2593_v7  ;;  %v2594_v45 = vunpack.i.l.bf16 %v2593_v7 }
 0x144   : > { %v2590_v18 = vunpack.i.h.bf16 %v2588_v37  ;;  %v2589_v8 = vunpack.i.l.bf16 %v2588_v37 }
 0x145   : > { %2113 = vmatpush3.bf16.msk.msra.mxu0 %vm3662_vm14, %v2111_v20  ;;  %v1034_v32 = vsel %vm553_vm8, %v2594_v45, %v2595_v46 }
 0x146   : > { %v1033_v21 = vsel %vm553_vm8, %v2589_v8, %v2590_v18  ;;  %2136 = vmatprep.subr.bf16.mxu0 %v2822_v6  ;;  %v2603_v42 = vpop.permute.xlu1 %2602 }
 0x147   : > { %v2133_v33 = vpack.c.bf16 %v1034_v32, %v1033_v21  ;;  %v2598_v47 = vpop.permute.xlu0 %2597  ;;  %v2605_v62 = vunpack.i.h.bf16 %v2603_v42  ;;  %v2604_v58 = vunpack.i.l.bf16 %v2603_v42 }
 0x148   : > { %v2600_v51 = vunpack.i.h.bf16 %v2598_v47  ;;  %v2599_v31 = vunpack.i.l.bf16 %v2598_v47  ;;  %1997 = vmatmul.mubr.msk.f32.vlgmr.msra.gmra.mrb[0].mxu0 %vm746_vm15, %v3672_v54 }
 0x149   : > { %2135 = vmatpush3.bf16.msk.msra.mxu1 %vm3662_vm14, %v2133_v33  ;;  %2058 = vmatprep.mubr.msk.f32.mxu0 %vm2830_vm3, %v3826_v4  ;;  %v1133_v36 = vsel %vm523_vm10, %v2604_v58, %v2605_v62 }
 0x14a   : > { %v1127_v30 = vsel %vm512_vm9, %v2599_v31, %v2600_v51  ;;  %2158 = vmatprep.subr.bf16.mxu1 %v2822_v6  ;;  %v2613_v0 = vpop.permute.xlu1 %2612 }
 0x14b   : > { %v3686_v34 = vpop.permute.xlu0 %2607  ;;  %v1201_v55 = vsel %vm609_vm5, %v1127_v30, %v1133_v36  ;;  %v2615_v59 = vunpack.i.h.bf16 %v2613_v0  ;;  %v2614_v57 = vunpack.i.l.bf16 %v2613_v0 }
 0x14c   : > { %v2610_v19 = vunpack.i.h.bf16 %v3686_v34  ;;  %v2609_v52 = vunpack.i.l.bf16 %v3686_v34  ;;  %2028 = vmatmul.mubr.msk.f32.vlgmr.msra.gmra.mrb[0].mxu1 %vm746_vm15, %v3672_v54  ;;  %v2137_v24 = vpack.c.bf16 %v1201_v55, %v1200_v11 }
 0x14d   : > { %2089 = vmatprep.mubr.msk.f32.mxu1 %vm2830_vm3, %v3826_v4  ;;  %v1417_v9 = vsel %vm512_vm9, %v2614_v57, %v2615_v59 }
 0x14e   : > { %2138 = vmatpush3.bf16.msra.mxu0 %v2137_v24  ;;  %v2623_v27 = vpop.permute.xlu1 %2622  ;;  %v1411_v22 = vsel %vm503_vm4, %v2610_v19, %v2609_v52 }
 0x14f   : > { %v2618_v38 = vpop.permute.xlu0 %2617  ;;  %2139 = vmatprep.subr.bf16.mxu0 %v2822_v6  ;;  %v2625_v48 = vunpack.i.h.bf16 %v2623_v27  ;;  %v2624_v25 = vunpack.i.l.bf16 %v2623_v27  ;;  %v1490_v50 = vsel %vm609_vm5, %v3007_v49, %v1411_v22  ;;  %v3827_v22 = vrot.slane %v3007_v49, 4 }
 0x150   : > { %v2620_v2 = vunpack.i.h.bf16 %v2618_v38  ;;  %v2619_v63 = vunpack.i.l.bf16 %v2618_v38 }
 0x151   : > { %v1143_v26 = vsel %vm539_vm11, %v2624_v25, %v2625_v48 }
 0x152   : > { %v1423_v43 = vsel %vm523_vm10, %v2619_v63, %v2620_v2  ;;  %v2633_v44 = vpop.permute.xlu1 %2632  ;;  %v1202_v17 = vsel %vm609_vm5, %v3571_v29, %v1143_v26 }
 0x153   : > { %v2628_v5 = vpop.permute.xlu0 %2627  ;;  %v1491_v60 = vsel %vm609_vm5, %v1417_v9, %v1423_v43  ;;  %v2635_v35 = vunpack.i.h.bf16 %v2633_v44  ;;  %v2634_v12 = vunpack.i.l.bf16 %v2633_v44 }
 0x154   : > { %v2630_v56 = vunpack.i.h.bf16 %v2628_v5  ;;  %v2629_v1 = vunpack.i.l.bf16 %v2628_v5  ;;  %v2159_v40 = vpack.c.bf16 %v1491_v60, %v1490_v50 }
 0x155   : > { %v1155_v61 = vsel %vm553_vm8, %v2634_v12, %v2635_v35  ;;  %v3828_v35 = vrot.slane %v3177_v15, 4 }
 0x156   : > { %v1149_v10 = vsel %vm546_vm7, %v2629_v1, %v2630_v56  ;;  %2160 = vmatpush3.bf16.msra.mxu1 %v2159_v40  ;;  %v2643_v16 = vpop.permute.xlu1 %2642 }
 0x157   : > { %v3710_v41 = vpop.permute.xlu0 %2637  ;;  %v1203_v39 = vsel %vm609_vm5, %v1149_v10, %v1155_v61  ;;  %2161 = vmatprep.subr.bf16.mxu1 %v2822_v6  ;;  %v2645_v53 = vunpack.i.h.bf16 %v2643_v16  ;;  %v2644_v13 = vunpack.i.l.bf16 %v2643_v16 }
 0x158   : > { %v2640_v3 = vunpack.i.h.bf16 %v3710_v41  ;;  %v2639_v28 = vunpack.i.l.bf16 %v3710_v41  ;;  %v2140_v14 = vpack.c.bf16 %v1203_v39, %v1202_v17 }
 0x159   : > { %v1433_v29 = vsel %vm539_vm11, %v2644_v13, %v2645_v53 }
 0x15a   : > { %2141 = vmatpush3.bf16.msra.mxu0 %v2140_v14  ;;  %v2653_v37 = vpop.permute.xlu1 %2652  ;;  %v1427_v45 = vsel %vm530_vm6, %v2639_v28, %v2640_v3 }
 0x15b   : > { %v2648_v20 = vpop.permute.xlu0 %2647  ;;  %v2655_v8 = vunpack.i.h.bf16 %v2653_v37  ;;  %v2654_v46 = vunpack.i.l.bf16 %v2653_v37  ;;  %2142 = vmatprep.subr.bf16.mxu0 %v2822_v6  ;;  %v1492_v62 = vsel %vm609_vm5, %v1427_v45, %v1433_v29 }
 0x15c   : > { %v2650_v7 = vunpack.i.h.bf16 %v2648_v20  ;;  %v2649_v18 = vunpack.i.l.bf16 %v2648_v20 }
 0x15d   : > { %v1445_v32 = vsel %vm553_vm8, %v2654_v46, %v2655_v8 }
 0x15e   : > { %v1439_v21 = vsel %vm546_vm7, %v2649_v18, %v2650_v7  ;;  %v2663_v47 = vpop.permute.xlu1 %2662 }
 0x15f   : > { %v2658_v33 = vpop.permute.xlu0 %2657  ;;  %v1493_v42 = vsel %vm609_vm5, %v1439_v21, %v1445_v32  ;;  %v2664_v4 = vunpack.i.l.bf16 %v2663_v47  ;;  %v2665_v48 = vunpack.i.h.bf16 %v2663_v47 }
 0x160   : > { %v2660_v51 = vunpack.i.h.bf16 %v2658_v33  ;;  %v2659_v31 = vunpack.i.l.bf16 %v2658_v33  ;;  %v2162_v58 = vpack.c.bf16 %v1493_v42, %v1492_v62 }
 0x161   : > { %v1168_v59 = vsel %vm503_vm4, %v2609_v52, %v2664_v4 }
 0x162   : > { %2163 = vmatpush3.bf16.msra.mxu1 %v2162_v58  ;;  %v2673_v36 = vpop.permute.xlu1 %2672  ;;  %v1161_v0 = vsel %vm560_vm12, %v2659_v31, %v2660_v51 }
 0x163   : > { %v2668_v30 = vpop.permute.xlu0 %2667  ;;  %2164 = vmatprep.subr.bf16.mxu1 %v2822_v6  ;;  %v2675_v11 = vunpack.i.h.bf16 %v2673_v36  ;;  %v2674_v24 = vunpack.i.l.bf16 %v2673_v36  ;;  %v1204_v2 = vsel %vm609_vm5, %v1161_v0, %v3827_v22 }
 0x164   : > { %v2670_v55 = vunpack.i.h.bf16 %v2668_v30  ;;  %v2669_v19 = vunpack.i.l.bf16 %v2668_v30 }
 0x165   : > { %v1451_v5 = vsel %vm560_vm12, %v2674_v24, %v2675_v11 }
 0x166   : > { %v1174_v57 = vsel %vm512_vm9, %v2669_v19, %v2670_v55  ;;  %v2678_v27 = vpop.permute.xlu1 %2677  ;;  %v1494_v12 = vsel %vm609_vm5, %v1451_v5, %v3828_v35 }
 0x167   : > { %v1457_v38 = vpop.permute.xlu0 %1456  ;;  %v1205_v63 = vsel %vm609_vm5, %v1168_v59, %v1174_v57  ;;  %v2680_v25 = vunpack.i.h.bf16 %v2678_v27  ;;  %v2679_v9 = vunpack.i.l.bf16 %v2678_v27 }
 0x168   : > { %v2143_v43 = vpack.c.bf16 %v1205_v63, %v1204_v2  ;;  %v1458_v34 = vsel %vm503_vm4, %v2665_v48, %v1457_v38  ;;  %vm1704_vm4 = vcmask 15360  }
 0x169   : > { %v1464_v52 = vsel %vm512_vm9, %v2679_v9, %v2680_v25 }
 0x16a   : > { %2144 = vmatpush3.bf16.msra.mxu0 %v2143_v43  ;;  %v2688_v50 = vpop.permute.xlu1 %2687  ;;  %v1495_v60 = vsel %vm609_vm5, %v1458_v34, %v1464_v52 }
 0x16b   : > { %v2683_v44 = vpop.permute.xlu0 %2682  ;;  %2145 = vmatprep.subr.bf16.mxu0 %v2822_v6  ;;  %v2689_v1 = vunpack.i.l.bf16 %v2688_v50  ;;  %v2165_v26 = vpack.c.bf16 %v1495_v60, %v1494_v12  ;;  %v2690_v8 = vunpack.i.h.bf16 %v2688_v50 }
 0x16c   : > { %v2685_v49 = vunpack.i.h.bf16 %v2683_v44  ;;  %v2684_v56 = vunpack.i.l.bf16 %v2683_v44 }
 0x16d   : > { %v1186_v10 = vsel %vm530_vm6, %v2689_v1, %v2639_v28  ;;  %2166 = vmatpush3.bf16.msra.mxu1 %v2165_v26 }
 0x16e   : > { %v1180_v40 = vsel %vm523_vm10, %v2684_v56, %v2685_v49  ;;  %v2698_v41 = vpop.permute.xlu1 %2697  ;;  %2167 = vmatprep.subr.bf16.mxu1 %v2822_v6 }
 0x16f   : > { %v2693_v61 = vpop.permute.xlu0 %2692  ;;  %v2700_v3 = vunpack.i.h.bf16 %v2698_v41  ;;  %v2699_v17 = vunpack.i.l.bf16 %v2698_v41  ;;  %v1206_v20 = vsel %vm609_vm5, %v1180_v40, %v1186_v10 }
 0x170   : > { %v2695_v16 = vunpack.i.h.bf16 %v2693_v61  ;;  %v2694_v39 = vunpack.i.l.bf16 %v2693_v61 }
 0x171   : > { %v1198_v15 = vsel %vm546_vm7, %v2699_v17, %v2700_v3 }
 0x172   : > { %v1192_v53 = vsel %vm539_vm11, %v2694_v39, %v2695_v16  ;;  %v1475_v14 = vpop.permute.xlu1 %1474 }
 0x173   : > { %v2703_v13 = vpop.permute.xlu0 %2702  ;;  %v1207_v37 = vsel %vm609_vm5, %v1192_v53, %v1198_v15  ;;  %v1476_v42 = vsel %vm530_vm6, %v2690_v8, %v1475_v14 }
 0x174   : > { %v2705_v28 = vunpack.i.h.bf16 %v2703_v13  ;;  %v2704_v7 = vunpack.i.l.bf16 %v2703_v13  ;;  %v2146_v18 = vpack.c.bf16 %v1207_v37, %v1206_v20 }
 0x176   : > { %2147 = vmatpush3.bf16.msra.mxu0 %v2146_v18  ;;  %v1470_v46 = vsel %vm523_vm10, %v2704_v7, %v2705_v28  ;;  %v2713_v29 = vpop.permute.xlu1 %2712 }
 0x177   : > { %v2708_v45 = vpop.permute.xlu0 %2707  ;;  %2148 = vmatprep.subr.bf16.mxu0 %v2822_v6  ;;  %v2715_v33 = vunpack.i.h.bf16 %v2713_v29  ;;  %v2714_v47 = vunpack.i.l.bf16 %v2713_v29  ;;  %v1496_v62 = vsel %vm609_vm5, %v1470_v46, %v1476_v42 }
 0x178   : > { %v2710_v21 = vunpack.i.h.bf16 %v2708_v45  ;;  %v2709_v32 = vunpack.i.l.bf16 %v2708_v45 }
 0x179   : > { %v1488_v31 = vsel %vm546_vm7, %v2714_v47, %v2715_v33 }
 0x17a   : > { %v1482_v51 = vsel %vm539_vm11, %v2709_v32, %v2710_v21  ;;  %v2723_v4 = vpop.permute.xlu1 %2722 }
 0x17b   : > { %v2718_v58 = vpop.permute.xlu0 %2717  ;;  %v1497_v30 = vsel %vm609_vm5, %v1482_v51, %v1488_v31  ;;  %v2725_v55 = vunpack.i.h.bf16 %v2723_v4  ;;  %v2724_v19 = vunpack.i.l.bf16 %v2723_v4 }
 0x17c   : > { %v2720_v36 = vunpack.i.h.bf16 %v2718_v58  ;;  %v2719_v0 = vunpack.i.l.bf16 %v2718_v58  ;;  %v2168_v11 = vpack.c.bf16 %v1497_v30, %v1496_v62 }
 0x17d   : > { %v1320_v59 = vsel %vm553_vm8, %v2724_v19, %v2725_v55 }
 0x17e   : > { %v1319_v24 = vsel %vm553_vm8, %v2719_v0, %v2720_v36  ;;  %2169 = vmatpush3.bf16.msra.mxu1 %v2168_v11  ;;  %v2733_v27 = vpop.permute.xlu1 %2732 }
 0x17f   : > { %v2149_v57 = vpack.c.bf16 %v1320_v59, %v1319_v24  ;;  %v2728_v38 = vpop.permute.xlu0 %2727  ;;  %v2735_v63 = vunpack.i.h.bf16 %v2733_v27  ;;  %v2734_v48 = vunpack.i.l.bf16 %v2733_v27  ;;  %2170 = vmatprep.subr.bf16.mxu1 %v2822_v6 }
 0x180   : > { %v2730_v22 = vunpack.i.h.bf16 %v2728_v38  ;;  %v2729_v2 = vunpack.i.l.bf16 %v2728_v38 }
 0x181   : > { %2150 = vmatpush3.bf16.msra.mxu0 %v2149_v57  ;;  %v1610_v9 = vsel %vm553_vm8, %v2734_v48, %v2735_v63 }
 0x182   : > { %v1609_v25 = vsel %vm553_vm8, %v2729_v2, %v2730_v22  ;;  %2151 = vmatprep.subr.bf16.mxu0 %v2822_v6  ;;  %v2743_v34 = vpop.permute.xlu1 %2742 }
 0x183   : > { %v2171_v43 = vpack.c.bf16 %v1610_v9, %v1609_v25  ;;  %v2738_v5 = vpop.permute.xlu0 %2737  ;;  %v2745_v50 = vunpack.i.h.bf16 %v2743_v34  ;;  %v2744_v60 = vunpack.i.l.bf16 %v2743_v34 }
 0x184   : > { %v2740_v52 = vunpack.i.h.bf16 %v2738_v5  ;;  %v2739_v44 = vunpack.i.l.bf16 %v2738_v5 }
 0x185   : > { %2172 = vmatpush3.bf16.msra.mxu1 %v2171_v43  ;;  %v1322_v56 = vsel %vm553_vm8, %v2744_v60, %v2745_v50 }
 0x186   : > { %v1321_v49 = vsel %vm553_vm8, %v2739_v44, %v2740_v52  ;;  %2173 = vmatprep.subr.bf16.mxu1 %v2822_v6  ;;  %v2753_v12 = vpop.permute.xlu1 %2752 }
 0x187   : > { %v2152_v1 = vpack.c.bf16 %v1322_v56, %v1321_v49  ;;  %v2748_v35 = vpop.permute.xlu0 %2747  ;;  %v2755_v10 = vunpack.i.h.bf16 %v2753_v12  ;;  %v2754_v61 = vunpack.i.l.bf16 %v2753_v12 }
 0x188   : > { %v2750_v26 = vunpack.i.h.bf16 %v2748_v35  ;;  %v2749_v40 = vunpack.i.l.bf16 %v2748_v35 }
 0x189   : > { %2153 = vmatpush3.bf16.msra.mxu0 %v2152_v1  ;;  %v1612_v16 = vsel %vm553_vm8, %v2754_v61, %v2755_v10 }
 0x18a   : > { %v1611_v41 = vsel %vm553_vm8, %v2749_v40, %v2750_v26  ;;  %2154 = vmatprep.subr.bf16.mxu0 %v2822_v6  ;;  %v2763_v17 = vpop.permute.xlu1 %2762 }
 0x18b   : > { %v2174_v39 = vpack.c.bf16 %v1612_v16, %v1611_v41  ;;  %v2758_v3 = vpop.permute.xlu0 %2757  ;;  %v2765_v13 = vunpack.i.h.bf16 %v2763_v17  ;;  %v2764_v14 = vunpack.i.l.bf16 %v2763_v17 }
 0x18c   : > { %v2760_v53 = vunpack.i.h.bf16 %v2758_v3  ;;  %v2759_v15 = vunpack.i.l.bf16 %v2758_v3 }
 0x18d   : > { %2175 = vmatpush3.bf16.msra.mxu1 %v2174_v39  ;;  %v1324_v37 = vsel %vm553_vm8, %v2764_v14, %v2765_v13 }
 0x18e   : > { %v1323_v20 = vsel %vm553_vm8, %v2759_v15, %v2760_v53  ;;  %2176 = vmatprep.subr.bf16.mxu1 %v2822_v6  ;;  %v2773_v18 = vpop.permute.xlu1 %2772 }
 0x18f   : > { %v2155_v28 = vpack.c.bf16 %v1324_v37, %v1323_v20  ;;  %v2768_v7 = vpop.permute.xlu0 %2767  ;;  %v2775_v45 = vunpack.i.h.bf16 %v2773_v18  ;;  %v2774_v29 = vunpack.i.l.bf16 %v2773_v18 }
 0x190   : > { %v2770_v8 = vunpack.i.h.bf16 %v2768_v7  ;;  %v2769_v46 = vunpack.i.l.bf16 %v2768_v7 }
 0x191   : > { %2157 = vmatpush3.bf16.msk.msra.mxu0 %vm3662_vm14, %v2155_v28  ;;  %v1614_v32 = vsel %vm553_vm8, %v2774_v29, %v2775_v45 }
 0x192   : > { %v1613_v21 = vsel %vm553_vm8, %v2769_v46, %v2770_v8 }
 0x193   : > { %v2177_v33 = vpack.c.bf16 %v1614_v32, %v1613_v21 }
 0x194   : > { %2059 = vmatmul.mubr.msk.f32.vlgmr.msra.gmra.mrb[2].mxu0 %vm746_vm15, %v3672_v54 }
 0x195   : > { %2179 = vmatpush3.bf16.msk.msra.mxu1 %vm3662_vm14, %v2177_v33 }
 0x198   : > { %2090 = vmatmul.mubr.msk.f32.vlgmr.msra.gmra.mrb[2].mxu1 %vm746_vm15, %v3672_v54 }
 0x21b   : > { %v818_v6 = vpop.f32.mrb[0].mxu0 }
 0x21c   : > { %v825_v47 = vmul.f32 %v818_v6, %v818_v6  ;;  %1699 = vst [vmem:[%s398_s30] sm:$0xff] %v818_v6  ;;  %822 = vadd.xlane.f32.xlu0 %v818_v6  ;;  %v1998_v42 = vpop.f32.mrb[1].mxu0 }
 0x21e   : > { %826 = vadd.xlane.f32.xlu1 %v825_v47 }
 0x21f   : > { %v1108_v51 = vpop.f32.mrb[0].mxu1 }
 0x220   : > { %v1115_v31 = vmul.f32 %v1108_v51, %v1108_v51  ;;  %1700 = vst [vmem:[%s398_s30 + $0x8] sm:$0xff] %v1108_v51  ;;  %1112 = vadd.xlane.f32.xlu0 %v1108_v51  ;;  %v2029_v23 = vpop.f32.mrb[1].mxu1 }
 0x224   : > { %1116 = vadd.xlane.f32.xlu0 %v1115_v31 }
 0x267   : > { %v1398_v62 = vpop.f32.mrb[2].mxu0 }
 0x268   : > { %v1405_v58 = vmul.f32 %v1398_v62, %v1398_v62  ;;  %1701 = vst [vmem:[%s398_s30 + $0x10] sm:$0xff] %v1398_v62  ;;  %1402 = vadd.xlane.f32.xlu1 %v1398_v62  ;;  %v2060_v54 = vpop.f32.mrb[3].mxu0 }
 0x26a   : > { %1406 = vadd.xlane.f32.xlu0 %v1405_v58 }
 0x26b   : > { %v1688_v4 = vpop.f32.mrb[2].mxu1 }
 0x26c   : > { %v1695_v30 = vmul.f32 %v1688_v4, %v1688_v4  ;;  %1702 = vst [vmem:[%s398_s30 + $0x18] sm:$0xff] %v1688_v4  ;;  %v2091_v36 = vpop.f32.mrb[3].mxu1  ;;  %1692 = vadd.xlane.f32.xlu1 %v1688_v4 }
 0x26e   : > { %1696 = vadd.xlane.f32.xlu0 %v1695_v30 }
 0x2a9   : > { %v823_v0 = vpop.xlane.xlu0 %822 }
 0x2ab   : > { %v827_v19 = vpop.xlane.xlu1 %826 }
 0x2ad   : > { %v1113_v55 = vpop.xlane.xlu0 %1112 }
 0x2ae   : > { %v1114_v57 = vadd.f32 %v1113_v55, %v823_v0 }
 0x2b1   : > { %v1117_v11 = vpop.xlane.xlu0 %1116 }
 0x2b2   : > { %v1118_v38 = vadd.f32 %v1117_v11, %v827_v19 }
 0x2f5   : > { %v1403_v24 = vpop.xlane.xlu1 %1402 }
 0x2f6   : > { %v1404_v22 = vadd.f32 %v1403_v24, %v1114_v57 }
 0x2f7   : > { %v1407_v59 = vpop.xlane.xlu0 %1406 }
 0x2f8   : > { %v1408_v2 = vadd.f32 %v1407_v59, %v1118_v38 }
 0x2f9   : > { %v1693_v27 = vpop.xlane.xlu1 %1692 }
 0x2fa   : > { %v1694_v48 = vadd.f32 %v1693_v27, %v1404_v22 }
 0x2fb   : > { %v1697_v63 = vpop.xlane.xlu0 %1696 }
 0x2fc   : > { %v1698_v25 = vadd.f32 %v1697_v63, %v1408_v2 }
 0x2fe   : > { %v1703_v9 = vsel %vm681_vm2, %v1694_v48, %v1698_v25 }
 0x2ff   : > { %1705 = vst.msk [vmem:[%s406_s12] sm:$0xff] %vm1704_vm4, %v1703_v9 }
 0x300 PF: > { %s16_s20 = sadd.s32 1, %s2812_s20   ;;  %s3829_s18 = smov %s2808_s19 }
 0x301   : > { %p13_p5 = scmp.ge.s32.totalorder %s16_s20, 4   ;;  %s3830_s19 = smov %s3832_s21 }
 0x303   :  { %15 = sbr.rel (!%p13_p5) target bundleno = 2 (0x2), region = 87 }

</bundles_post_ra>
